<compile_context>
chip_gen: v5e
topology: v5e:2x2
jax: 0.10.0
libtpu: 0.0.40
codegen_flags: <defaults>
</compile_context>

<pallas_src>
import functools
import math

import jax
import jax.numpy as jnp
from jax.experimental import pallas as pl
from jax.experimental.pallas import tpu as pltpu


def _round_up(x, m):
    return (x + m - 1) // m * m


_LANE = 128
_VMEM_LIMIT = 32 * 1024 * 1024     # explicit scoped-VMEM limit (v5e default is 16 MiB)
_FUSED_BYTES = 12 * 1024 * 1024    # budget for the single-pass (M-resident) conv path
_BN_EPS = 1e-5


# --------------------------------------------------------------------------
# Fused conv (im2col matmul) + BatchNorm(train) + residual + ReLU kernels
# --------------------------------------------------------------------------
def _make_conv_bn_kernel(m_true, act, has_res, eps):
    """Single-pass kernel: full-K dot, BN stats over the resident M rows, affine,
    optional residual, optional ReLU, bf16 store."""
    inv_m = 1.0 / float(m_true)

    def kernel(*refs):
        if has_res:
            a_ref, b_ref, gb_ref, r_ref, o_ref = refs
        else:
            a_ref, b_ref, gb_ref, o_ref = refs
        acc = jnp.dot(a_ref[...], b_ref[...], preferred_element_type=jnp.float32)
        gb = gb_ref[...]
        # Pad rows of A are exactly zero, so summing all rows / m_true is exact.
        mean = jnp.sum(acc, axis=0, keepdims=True) * inv_m
        var = jnp.maximum(
            jnp.sum(acc * acc, axis=0, keepdims=True) * inv_m - mean * mean, 0.0)
        scale = gb[0:1, :] * jax.lax.rsqrt(var + eps)
        shift = gb[1:2, :] - mean * scale
        y = acc * scale + shift
        if has_res:
            y = y + r_ref[...].astype(jnp.float32)
        if act:
            y = jnp.maximum(y, 0.0)
        o_ref[...] = y.astype(o_ref.dtype)

    return kernel


def _mm_stats_kernel(a_ref, b_ref, p_ref, s_ref):
    """M-tiled pass 1: matmul tile + cross-M-tile per-channel sum / sum-of-squares."""
    @pl.when(pl.program_id(1) == 0)
    def _():
        s_ref[...] = jnp.zeros_like(s_ref)

    acc = jnp.dot(a_ref[...], b_ref[...], preferred_element_type=jnp.float32)
    p_ref[...] = acc.astype(p_ref.dtype)
    s_ref[...] += jnp.concatenate(
        [jnp.sum(acc, axis=0, keepdims=True),
         jnp.sum(acc * acc, axis=0, keepdims=True)], axis=0)


def _make_bn_apply_kernel(m_true, act, has_res, eps):
    """M-tiled pass 2: finalize BN from accumulated stats, apply affine/res/relu."""
    inv_m = 1.0 / float(m_true)

    def kernel(*refs):
        if has_res:
            p_ref, s_ref, gb_ref, r_ref, o_ref = refs
        else:
            p_ref, s_ref, gb_ref, o_ref = refs
        s = s_ref[...]
        gb = gb_ref[...]
        mean = s[0:1, :] * inv_m
        var = jnp.maximum(s[1:2, :] * inv_m - mean * mean, 0.0)
        scale = gb[0:1, :] * jax.lax.rsqrt(var + eps)
        shift = gb[1:2, :] - mean * scale
        y = p_ref[...].astype(jnp.float32) * scale + shift
        if has_res:
            y = y + r_ref[...].astype(jnp.float32)
        if act:
            y = jnp.maximum(y, 0.0)
        o_ref[...] = y.astype(o_ref.dtype)

    return kernel


def conv_bn_act(patches, w_p, gb_p, *, n_true, act, residual=None, eps=_BN_EPS,
                force_tiled=None, tm=512):
    """patches: [M, K] bf16, w_p: [Kp, Np] bf16 (pre-packed weight), gb_p: [2, Np] f32.
    Returns bf16 [M, n_true] of act?(BN_train(patches @ W) (+ residual))."""
    M, K = patches.shape
    Kp, Np = w_p.shape
    tn = _LANE
    has_res = residual is not None

    # Single-pass (M resident) if it fits a VMEM budget, else the M-tiled two-pass path
    # (mandatory at realistic resolutions on v7x's 64 MiB VMEM; also unlocks megacore).
    Mp_f = _round_up(M, 16)
    est = (Mp_f * Kp * 2 + 2 * Kp * tn * 2
           + Mp_f * tn * (4 + 2 * 2 + (2 * 2 if has_res else 0)))
    tiled = (est > _FUSED_BYTES) if force_tiled is None else force_tiled

    if not tiled:
        Mp = Mp_f
        a_p = jnp.pad(patches, ((0, Mp - M), (0, Kp - K)))
        inputs = [a_p, w_p, gb_p]
        in_specs = [
            pl.BlockSpec((Mp, Kp), lambda j: (0, 0)),   # constant index: fetched once
            pl.BlockSpec((Kp, tn), lambda j: (0, j)),
            pl.BlockSpec((2, tn), lambda j: (0, j)),
        ]
        if has_res:
            r_p = jnp.pad(residual.astype(jnp.bfloat16),
                          ((0, Mp - M), (0, Np - residual.shape[1])))
            inputs.append(r_p)
            in_specs.append(pl.BlockSpec((Mp, tn), lambda j: (0, j)))
        out = pl.pallas_call(
            _make_conv_bn_kernel(M, act, has_res, eps),
            out_shape=jax.ShapeDtypeStruct((Mp, Np), jnp.bfloat16),
            grid_spec=pltpu.PrefetchScalarGridSpec(
                num_scalar_prefetch=0,
                grid=(Np // tn,),
                in_specs=in_specs,
                out_specs=pl.BlockSpec((Mp, tn), lambda j: (0, j)),
            ),
            compiler_params=pltpu.CompilerParams(
                dimension_semantics=("parallel",),
                vmem_limit_bytes=_VMEM_LIMIT),
        )(*inputs)
        return out[:M, :n_true]

    # ---------------- M-tiled two-pass path ----------------
    Mp = _round_up(M, tm)
    a_p = jnp.pad(patches, ((0, Mp - M), (0, Kp - K)))

    prod, stats = pl.pallas_call(
        _mm_stats_kernel,
        out_shape=(jax.ShapeDtypeStruct((Mp, Np), jnp.bfloat16),
                   jax.ShapeDtypeStruct((2, Np), jnp.float32)),
        grid_spec=pltpu.PrefetchScalarGridSpec(
            num_scalar_prefetch=0,
            grid=(Np // tn, Mp // tm),
            in_specs=[pl.BlockSpec((tm, Kp), lambda j, m: (m, 0)),
                      pl.BlockSpec((Kp, tn), lambda j, m: (0, j))],
            out_specs=(pl.BlockSpec((tm, tn), lambda j, m: (m, j)),
                       pl.BlockSpec((2, tn), lambda j, m: (0, j))),
        ),
        compiler_params=pltpu.CompilerParams(
            dimension_semantics=("parallel", "arbitrary"),
            vmem_limit_bytes=_VMEM_LIMIT),
    )(a_p, w_p)

    inputs = [prod, stats, gb_p]
    in_specs = [pl.BlockSpec((tm, tn), lambda j, m: (m, j)),
                pl.BlockSpec((2, tn), lambda j, m: (0, j)),
                pl.BlockSpec((2, tn), lambda j, m: (0, j))]
    if has_res:
        r_p = jnp.pad(residual.astype(jnp.bfloat16),
                      ((0, Mp - M), (0, Np - residual.shape[1])))
        inputs.append(r_p)
        in_specs.append(pl.BlockSpec((tm, tn), lambda j, m: (m, j)))
    out = pl.pallas_call(
        _make_bn_apply_kernel(M, act, has_res, eps),
        out_shape=jax.ShapeDtypeStruct((Mp, Np), jnp.bfloat16),
        grid_spec=pltpu.PrefetchScalarGridSpec(
            num_scalar_prefetch=0,
            grid=(Np // tn, Mp // tm),
            in_specs=in_specs,
            out_specs=pl.BlockSpec((tm, tn), lambda j, m: (m, j)),
        ),
        compiler_params=pltpu.CompilerParams(
            dimension_semantics=("parallel", "parallel"),
            vmem_limit_bytes=_VMEM_LIMIT),
    )(*inputs)
    return out[:M, :n_true]


# --------------------------------------------------------------------------
# Fused classifier head: avgpool*scale + (opt) embed linear + relu(W_cat) + matmul
# --------------------------------------------------------------------------
def _make_head_kernel(has_embed, scale):
    def kernel(*refs):
        if has_embed:
            x_ref, wl_ref, bl_ref, wc_ref, bc_ref, logit_ref, wr_ref = refs
        else:
            x_ref, wc_ref, bc_ref, logit_ref, wr_ref = refs
        feat = jnp.mean(x_ref[...].astype(jnp.float32), axis=1) * scale   # (B, C)
        if has_embed:
            feat = jnp.dot(feat, wl_ref[...],
                           preferred_element_type=jnp.float32) + bl_ref[...]
        wr = jnp.maximum(wc_ref[...], 0.0)
        wr_ref[...] = wr
        logit_ref[...] = jax.lax.dot_general(
            feat, wr, (((1,), (1,)), ((), ())),
            preferred_element_type=jnp.float32) + bc_ref[...]

    return kernel


# --------------------------------------------------------------------------
# Elementwise / pooling glue
# --------------------------------------------------------------------------
def maxpool2d_3x3_s2_p1(x):
    """Running max over the 9 shifted/strided windows (no [9, M, C] materialization)."""
    N, H, W, C = x.shape
    OH = (H + 2 - 3) // 2 + 1
    OW = (W + 2 - 3) // 2 + 1
    neg = float(jnp.finfo(x.dtype).min)
    xp = jnp.pad(x, ((0, 0), (1, 1), (1, 1), (0, 0)), constant_values=neg)
    out = None
    for ki in range(3):
        for kj in range(3):
            win = xp[:, ki:ki + 2 * (OH - 1) + 1:2,
                     kj:kj + 2 * (OW - 1) + 1:2, :]
            out = win if out is None else jnp.maximum(out, win)
    return out


def _im2col(x, kh, kw, stride, padding):
    # TODO(synk): window extraction stays in XLA glue (bf16); fully in-kernel window
    # generation needs strided-window DMA for stride-2.
    N, H, W, Cin = x.shape
    OH = (H + 2 * padding - kh) // stride + 1
    OW = (W + 2 * padding - kw) // stride + 1
    xp = jnp.pad(x, ((0, 0), (padding, padding), (padding, padding), (0, 0)))
    cols = []
    for ki in range(kh):
        for kj in range(kw):
            cols.append(xp[:, ki:ki + stride * (OH - 1) + 1:stride,
                            kj:kj + stride * (OW - 1) + 1:stride, :])
    patches = jnp.stack(cols, axis=3).reshape(N * OH * OW, kh * kw * Cin)
    return patches.astype(jnp.bfloat16), (N, OH, OW)


def conv_bn(x, cparams, kh, kw, stride, padding, cout, *, act, residual=None):
    patches, (n, oh, ow) = _im2col(x, kh, kw, stride, padding)
    out = conv_bn_act(patches, cparams['w'], cparams['gb'], n_true=cout,
                      act=act, residual=residual)
    return out, (n, oh, ow, cout)


def basic_block(x, bp, planes, stride):
    """torchvision BasicBlock (expansion = 1), fully fused conv+BN(+res)+ReLU."""
    N, H, W, Cin = x.shape
    if 'ds' in bp:
        idn, _ = conv_bn(x, bp['ds'], 1, 1, stride, 0, planes, act=False)
    else:
        idn = x.reshape(N * H * W, Cin)
    y, (n, oh, ow, c) = conv_bn(x, bp['conv1'], 3, 3, stride, 1, planes, act=True)
    y = y.reshape(n, oh, ow, c)
    out, _ = conv_bn(y, bp['conv2'], 3, 3, 1, 1, planes, act=True, residual=idn)
    return out.reshape(n, oh, ow, c)


# --------------------------------------------------------------------------
# Parameter init (deterministic, mirroring the module's __init__)
# --------------------------------------------------------------------------
def init_params(key, layers, embed_dim, num_class):
    keys = iter(jax.random.split(key, 256))

    def conv_w(cout, cin, kh, kw):
        n = kh * kw * cout
        return jax.random.normal(next(keys), (cout, cin, kh, kw),
                                 jnp.float32) * math.sqrt(2.0 / n)

    def linear_wb(out_f, in_f):
        bound = 1.0 / math.sqrt(in_f)
        w = jax.random.uniform(next(keys), (out_f, in_f), jnp.float32, -bound, bound)
        b = jax.random.uniform(next(keys), (out_f,), jnp.float32, -bound, bound)
        return w, b

    params = {
        'conv1_w': conv_w(64, 3, 7, 7),
        'bn1_g': jnp.ones((64,), jnp.float32),
        'bn1_b': jnp.zeros((64,), jnp.float32),
        'layers': [],
    }
    inplanes = 64
    for li, (planes, nblocks) in enumerate(zip((64, 128, 256, 512), layers)):
        layer = []
        for bi in range(nblocks):
            stride = 2 if (li > 0 and bi == 0) else 1
            bp = {
                'conv1_w': conv_w(planes, inplanes, 3, 3),
                'bn1_g': jnp.ones((planes,), jnp.float32),
                'bn1_b': jnp.zeros((planes,), jnp.float32),
                'conv2_w': conv_w(planes, planes, 3, 3),
                'bn2_g': jnp.ones((planes,), jnp.float32),
                'bn2_b': jnp.zeros((planes,), jnp.float32),
            }
            if stride != 1 or inplanes != planes:
                bp['ds_w'] = conv_w(planes, inplanes, 1, 1)
                bp['ds_g'] = jnp.ones((planes,), jnp.float32)
                bp['ds_b'] = jnp.zeros((planes,), jnp.float32)
            layer.append(bp)
            inplanes = planes
        params['layers'].append(layer)

    if embed_dim != 512:
        params['linear_w'], params['linear_b'] = linear_wb(embed_dim, 512)
    params['fc2_w'], params['fc2_b'] = linear_wb(num_class, embed_dim)
    params['fc22_w'], params['fc22_b'] = linear_wb(80, embed_dim)
    return params


def _prep_conv(w, gamma, beta):
    cout, cin, kh, kw = w.shape
    k = kh * kw * cin
    kp = _round_up(k, _LANE)
    np_ = _round_up(cout, _LANE)
    wmat = jnp.transpose(w, (2, 3, 1, 0)).reshape(k, cout).astype(jnp.bfloat16)
    w_p = jnp.pad(wmat, ((0, kp - k), (0, np_ - cout)))
    gb = jnp.stack([gamma, beta], axis=0).astype(jnp.float32)
    gb_p = jnp.pad(gb, ((0, 0), (0, np_ - cout)))
    return {'w': w_p, 'gb': gb_p}


def prepare_params(raw, embed_dim, num_class):
    """One-time weight packing (transpose/reshape/bf16-cast/pad) hoisted OUT of the
    forward graph so no per-forward weight repacking remains."""
    prepped = {'conv1': _prep_conv(raw['conv1_w'], raw['bn1_g'], raw['bn1_b']),
               'layers': []}
    for layer in raw['layers']:
        blocks = []
        for bp in layer:
            b = {'conv1': _prep_conv(bp['conv1_w'], bp['bn1_g'], bp['bn1_b']),
                 'conv2': _prep_conv(bp['conv2_w'], bp['bn2_g'], bp['bn2_b'])}
            if 'ds_w' in bp:
                b['ds'] = _prep_conv(bp['ds_w'], bp['ds_g'], bp['ds_b'])
            blocks.append(b)
        prepped['layers'].append(blocks)

    head = {}
    ep = _round_up(embed_dim, _LANE)
    if embed_dim != 512:
        head['wlin'] = jnp.pad(raw['linear_w'].astype(jnp.float32).T,
                               ((0, 0), (0, ep - embed_dim)))
        head['blin'] = jnp.pad(raw['linear_b'].astype(jnp.float32),
                               (0, ep - embed_dim)).reshape(1, ep)
    c0 = num_class + 80
    cp = _round_up(c0, _LANE)
    wcat = jnp.concatenate([raw['fc2_w'], raw['fc22_w']], axis=0).astype(jnp.float32)
    bcat = jnp.concatenate([raw['fc2_b'], raw['fc22_b']], axis=0).astype(jnp.float32)
    head['wcat'] = jnp.pad(wcat, ((0, cp - c0), (0, ep - embed_dim)))
    head['bcat'] = jnp.pad(bcat, (0, cp - c0)).reshape(1, cp)
    prepped['head'] = head
    return prepped


# --------------------------------------------------------------------------
# Forward pass (ResNet.forward with phase='none', mlp_local=False)
# --------------------------------------------------------------------------
def resnet_forward(x_nchw, params, *, scale, embed_dim, num_class, is_train):
    x = jnp.transpose(x_nchw.astype(jnp.float32), (0, 2, 3, 1))  # NCHW -> NHWC

    y, (n, oh, ow, c) = conv_bn(x, params['conv1'], 7, 7, 2, 3, 64, act=True)
    y = y.reshape(n, oh, ow, c)
    y = maxpool2d_3x3_s2_p1(y)

    for li, layer in enumerate(params['layers']):
        planes = 64 * (2 ** li)
        for bi, bp in enumerate(layer):
            stride = 2 if (li > 0 and bi == 0) else 1
            y = basic_block(y, bp, planes, stride)

    N, H, W, C = y.shape
    if not is_train:
        # Eval path.  TODO(synk): phase == 'extract_conv_feature' (mlp_local head +
        # L2 normalize) is not exercised in this synthetic config (phase='none').
        feat = jnp.mean(y.astype(jnp.float32).reshape(N, H * W, C), axis=1) * scale
        if embed_dim != 512:
            feat = (feat @ params['head']['wlin'] + params['head']['blin'])[:, :embed_dim]
        return feat

    # Fused tail: avgpool*scale + optional embed linear + relu(W_cat) + one
    # concatenated-classifier matmul, all in a single pallas_call.
    hp = params['head']
    has_embed = 'wlin' in hp
    Bp = _round_up(N, 8)
    x3 = jnp.pad(y.reshape(N, H * W, C), ((0, Bp - N), (0, 0), (0, 0)))
    cp = hp['wcat'].shape[0]
    ep = hp['wcat'].shape[1]
    ins = [x3] + ([hp['wlin'], hp['blin']] if has_embed else []) + [hp['wcat'], hp['bcat']]
    logits, wr = pl.pallas_call(
        _make_head_kernel(has_embed, float(scale)),
        out_shape=(jax.ShapeDtypeStruct((Bp, cp), jnp.float32),
                   jax.ShapeDtypeStruct((cp, ep), jnp.float32)),
        compiler_params=pltpu.CompilerParams(vmem_limit_bytes=_VMEM_LIMIT),
    )(*ins)

    # PyTorch mutates class_fc_2/22.weight.data = relu(weight) then applies the fcs;
    # here the relu'd copies are computed in-kernel and returned.
    x1 = logits[:N, :num_class]
    x2 = logits[:N, num_class:num_class + 80]
    w2 = wr[:num_class, :embed_dim]
    w22 = wr[num_class:num_class + 80, :embed_dim]
    return x1, x2, w2, w22


if __name__ == "__main__":
    # ResNet(BasicBlock, layers=[1,1,1,1], embed_dim=64, num_class=10, is_train=1, scale=2)
    LAYERS = [1, 1, 1, 1]
    EMBED_DIM = 64
    NUM_CLASS = 10
    SCALE = 2
    IS_TRAIN = True

    key = jax.random.PRNGKey(0)
    pkey, xkey, tkey = jax.random.split(key, 3)
    raw = init_params(pkey, LAYERS, EMBED_DIM, NUM_CLASS)
    params = jax.block_until_ready(prepare_params(raw, EMBED_DIM, NUM_CLASS))
    x = jax.random.normal(xkey, (2, 3, 32, 32), jnp.float32)   # NCHW like PyTorch

    # Sanity-check the M-tiled (large-M / v7x) conv path against the fused path.
    ka, kb, kr = jax.random.split(tkey, 3)
    ap = jax.random.normal(ka, (512, 384), jnp.float32).astype(jnp.bfloat16)
    wp = (jax.random.normal(kb, (384, 256), jnp.float32) / 20.0).astype(jnp.bfloat16)
    gbp = jnp.stack([jnp.ones((256,), jnp.float32), jnp.zeros((256,), jnp.float32)], 0)
    rp = jax.random.normal(kr, (512, 256), jnp.float32).astype(jnp.bfloat16)
    y_fused = conv_bn_act(ap, wp, gbp, n_true=256, act=True, residual=rp,
                          force_tiled=False)
    y_tiled = conv_bn_act(ap, wp, gbp, n_true=256, act=True, residual=rp,
                          force_tiled=True, tm=128)
    err = float(jnp.max(jnp.abs(y_fused.astype(jnp.float32)
                                - y_tiled.astype(jnp.float32))))
    assert err < 0.25, f"tiled/fused conv mismatch: {err}"

    fwd = jax.jit(functools.partial(resnet_forward, scale=SCALE,
                                    embed_dim=EMBED_DIM, num_class=NUM_CLASS,
                                    is_train=IS_TRAIN))
    x1, x2, w2, w22 = fwd(x, params)
    jax.block_until_ready((x1, x2, w2, w22))

    assert x1.shape == (2, NUM_CLASS)
    assert x2.shape == (2, 80)
    assert w2.shape == (NUM_CLASS, EMBED_DIM)
    assert w22.shape == (80, EMBED_DIM)
    print("KERNEL_OK")
</pallas_src>

<mosaic_0001>
module attributes {stable_mosaic.version = 11 : i64} {
  func.func @kernel(%arg0: i32, %arg1: memref<512x384xbf16, #tpu.memory_space<vmem>>, %arg2: memref<384x128xbf16, #tpu.memory_space<vmem>>, %arg3: memref<2x128xf32, #tpu.memory_space<vmem>>, %arg4: memref<512x128xbf16, #tpu.memory_space<vmem>>, %arg5: memref<512x128xbf16, #tpu.memory_space<vmem>>) attributes {dimension_semantics = [#tpu.dimension_semantics<parallel>], iteration_bounds = array<i64: 2>, scalar_prefetch = 0 : i64, scratch_operands = 0 : i64, tpu.core_type = #tpu.core_type<tc>, window_params = [{pipeline_mode = #tpu.pipeline_mode<synchronous>, transform_indices = @transform_0, window_bounds = array<i64: 512, 384>}, {transform_indices = @transform_1, window_bounds = array<i64: 384, 128>}, {transform_indices = @transform_2, window_bounds = array<i64: 2, 128>}, {transform_indices = @transform_3, window_bounds = array<i64: 512, 128>}, {transform_indices = @transform_4, window_bounds = array<i64: 512, 128>}]} {
    %c0 = arith.constant 0 : index
    %c0_0 = arith.constant 0 : index
    %0 = vector.load %arg1[%c0, %c0_0] : memref<512x384xbf16, #tpu.memory_space<vmem>>, vector<512x384xbf16>
    %c0_1 = arith.constant 0 : index
    %c0_2 = arith.constant 0 : index
    %1 = vector.load %arg2[%c0_1, %c0_2] : memref<384x128xbf16, #tpu.memory_space<vmem>>, vector<384x128xbf16>
    %cst = arith.constant dense<0.000000e+00> : vector<512x128xf32>
    %2 = tpu.matmul %0, %1, %cst {dimension_numbers = #tpu.dot_dimension_numbers<[1], [0], [0], [1], [0, 0, 1, 1], [], []>} : vector<512x384xbf16>, vector<384x128xbf16>, vector<512x128xf32> -> vector<512x128xf32>
    %c0_3 = arith.constant 0 : index
    %c0_4 = arith.constant 0 : index
    %3 = vector.load %arg3[%c0_3, %c0_4] : memref<2x128xf32, #tpu.memory_space<vmem>>, vector<2x128xf32>
    %cst_5 = arith.constant dense<0.000000e+00> : vector<128xf32>
    %4 = vector.multi_reduction <add>, %2, %cst_5 [0] : vector<512x128xf32> to vector<128xf32>
    %5 = vector.shape_cast %4 : vector<128xf32> to vector<1x128xf32>
    %cst_6 = arith.constant 0.001953125 : f32
    %6 = vector.broadcast %cst_6 : f32 to vector<1x128xf32>
    %7 = arith.mulf %5, %6 : vector<1x128xf32>
    %8 = arith.mulf %2, %2 : vector<512x128xf32>
    %cst_7 = arith.constant dense<0.000000e+00> : vector<128xf32>
    %9 = vector.multi_reduction <add>, %8, %cst_7 [0] : vector<512x128xf32> to vector<128xf32>
    %10 = vector.shape_cast %9 : vector<128xf32> to vector<1x128xf32>
    %cst_8 = arith.constant 0.001953125 : f32
    %11 = vector.broadcast %cst_8 : f32 to vector<1x128xf32>
    %12 = arith.mulf %10, %11 : vector<1x128xf32>
    %13 = arith.mulf %7, %7 : vector<1x128xf32>
    %14 = arith.subf %12, %13 : vector<1x128xf32>
    %cst_9 = arith.constant 0.000000e+00 : f32
    %15 = vector.broadcast %cst_9 : f32 to vector<1x128xf32>
    %16 = arith.maximumf %14, %15 : vector<1x128xf32>
    %17 = vector.extract_strided_slice %3 {offsets = [0, 0], sizes = [1, 128], strides = [1, 1]} : vector<2x128xf32> to vector<1x128xf32>
    %cst_10 = arith.constant 9.99999974E-6 : f32
    %18 = vector.broadcast %cst_10 : f32 to vector<1x128xf32>
    %19 = arith.addf %16, %18 : vector<1x128xf32>
    %20 = math.rsqrt %19 : vector<1x128xf32>
    %21 = arith.mulf %17, %20 : vector<1x128xf32>
    %22 = vector.extract_strided_slice %3 {offsets = [1, 0], sizes = [1, 128], strides = [1, 1]} : vector<2x128xf32> to vector<1x128xf32>
    %23 = arith.mulf %7, %21 : vector<1x128xf32>
    %24 = arith.subf %22, %23 : vector<1x128xf32>
    %25 = vector.broadcast %21 : vector<1x128xf32> to vector<512x128xf32>
    %26 = arith.mulf %2, %25 : vector<512x128xf32>
    %27 = vector.broadcast %24 : vector<1x128xf32> to vector<512x128xf32>
    %28 = arith.addf %26, %27 : vector<512x128xf32>
    %c0_11 = arith.constant 0 : index
    %c0_12 = arith.constant 0 : index
    %29 = vector.load %arg4[%c0_11, %c0_12] : memref<512x128xbf16, #tpu.memory_space<vmem>>, vector<512x128xbf16>
    %30 = arith.extf %29 : vector<512x128xbf16> to vector<512x128xf32>
    %31 = arith.addf %28, %30 : vector<512x128xf32>
    %cst_13 = arith.constant 0.000000e+00 : f32
    %32 = vector.broadcast %cst_13 : f32 to vector<512x128xf32>
    %33 = arith.maximumf %31, %32 : vector<512x128xf32>
    %34 = arith.truncf %33 : vector<512x128xf32> to vector<512x128xbf16>
    %c0_14 = arith.constant 0 : index
    %c0_15 = arith.constant 0 : index
    %35 = vector.load %arg5[%c0_14, %c0_15] : memref<512x128xbf16, #tpu.memory_space<vmem>>, vector<512x128xbf16>
    tpu.vector_store %arg5[%c0_14, %c0_15], %34 {strides = array<i32>} : memref<512x128xbf16, #tpu.memory_space<vmem>>, vector<512x128xbf16>,
    return
  }
  func.func @transform_0(%arg0: i32) -> (i32, i32) {
    %c0_i32 = arith.constant 0 : i32
    %c0_i32_0 = arith.constant 0 : i32
    %c0_i32_1 = arith.constant 0 : i32
    return %c0_i32, %c0_i32_0 : i32, i32
  }
  func.func @transform_1(%arg0: i32) -> (i32, i32) {
    %c0_i32 = arith.constant 0 : i32
    %c0_i32_0 = arith.constant 0 : i32
    return %c0_i32, %arg0 : i32, i32
  }
  func.func @transform_2(%arg0: i32) -> (i32, i32) {
    %c0_i32 = arith.constant 0 : i32
    %c0_i32_0 = arith.constant 0 : i32
    return %c0_i32, %arg0 : i32, i32
  }
  func.func @transform_3(%arg0: i32) -> (i32, i32) {
    %c0_i32 = arith.constant 0 : i32
    %c0_i32_0 = arith.constant 0 : i32
    return %c0_i32, %arg0 : i32, i32
  }
  func.func @transform_4(%arg0: i32) -> (i32, i32) {
    %c0_i32 = arith.constant 0 : i32
    %c0_i32_0 = arith.constant 0 : i32
    return %c0_i32, %arg0 : i32, i32
  }
}

</mosaic_0001>

<bundles_post_ra>
// kernel: tpu_custom_call.1
= control target key start
LH: loop header
LB: loop body
LE: loop exit
PB: predicated region body
PF: predicated region fallthrough
CT: control target
= control target key end

     0   :  { %s5449_s0 = inlined_call_operand.hbm [shape: bf16[512,384], index: 0, kind: input, shape index: {}]   ;;  %s5450_s1 = inlined_call_operand.hbm [shape: bf16[384,256], index: 1, kind: input, shape index: {}]   ;;  %s5451_s2 = inlined_call_operand.hbm [shape: f32[2,256], index: 2, kind: input, shape index: {}]   ;;  %s5452_s3 = inlined_call_operand.hbm [shape: bf16[512,256], index: 3, kind: input, shape index: {}]   ;;  %s5453_s4 = inlined_call_operand.hbm [shape: bf16[512,256], index: 4, kind: output, shape index: {}]  }
   0x1   :  { %5545 = sst [smem:[#allocation72_spill]] %s5449_s0 }
   0x2   :  { %5546 = sst [smem:[#allocation73_spill]] %s5450_s1 }
   0x3   :  { %9 = vsyncpa [#allocation3], 0 }
   0x4   :  { %10 = vsyncpa [#allocation6], 0 }
   0x5   :  { %12 = vsyncpa [#allocation6 + $0x1], 0 }
   0x6   :  { %13 = vsyncpa [#allocation9], 0 }
   0x7   :  { %15 = vsyncpa [#allocation9 + $0x1], 0 }
   0x8   :  { %16 = vsyncpa [#allocation4], 0 }
   0x9   :  { %18 = vsyncpa [#allocation4 + $0x1], 0  ;;  %s3833_s15 = smov 0   ;;  %s3835_s16 = smov 0  }
   0xa   :  { %s3837_s17 = smov 0   ;;  %s3839_s18 = smov 0  }
   0xb LB: > { %5547 = sst [smem:[#allocation15_spill]] %s3793_s17  ;;  %s3854_s19 = sadd.s32 1, %s3797_s18   ;;  %s3797_s18 = sphi %s3839_s18, %s5844_s18   ;;  %s3793_s17 = sphi %s3837_s17, %s5841_s17   ;;  %s3789_s16 = sphi %s3835_s16, %s5843_s16   ;;  %s3785_s15 = sphi %s3833_s15, %s5842_s15  }
   0xc   : > { %s52_s20 = sadd.s32 1, %s3793_s17  ;;  %s49_s21 = ssub.s32 %s3797_s18, %s3854_s19 }
   0xd   : > { %p59_p0 = scmp.ne.s32.totalorder %s3793_s17, %s3789_s16  ;;  %p50_p1 = scmp.eq.s32.totalorder %s49_s21, 0 }
   0xe   : > { %p60_p2 = scmp.eq.s32.totalorder %s3797_s18, 0  ;;  %p3557_p4 = scmp.lt.s32.totalorder %s3797_s18, 2 }
   0xf   : > { %s3865_s22 = scalar_select %p50_p1, %s3793_s17, %s52_s20  }
  0x10   : > { %p61_p5 = por %p60_p2, %p59_p0  ;;  %s181_s23 = sand.u32 1, %s3797_s18  }
  0x11   : > { %5548 = sst [smem:[#allocation16_spill]] %s3865_s22  ;;  %s3872_s24 = sand.u32 1, %s3793_s17  }
  0x12   : > { %s3524_s25 = smul.u32 192, %s3872_s24  ;;  %s5457_s26 = sshll.u32 %s3797_s18, 2 }
  0x13   : > { %s5549_s1 = sld [smem:[#allocation73_spill]]  ;;  %p3881_p6 = pnand %p3557_p4, %p61_p5 }
  0x14   : > { %s185_s6 = scalar_lea.vmem [#allocation5], %s3524_s25  ;;  %s3885_s8 = scalar_lea.sflag [#allocation6], %s181_s23 }
  0x15   : > { %s192_s7 = sshll.u32 %s185_s6, 4  ;;  %p3607_p8 = pneg %p3881_p6  ;;  %s193_s7 = int_to_ptr.vmem [resolvable:$true] %s192_s7 }
  0x19   : > { %s189_s29 = scalar_lea.hbm %s5549_s1, %s5457_s26  ;;  %s3610_s13 = scalar_lea.hbm %s5549_s1, 384 }
  0x1a   : > { %s190_s5 = sshll.u32 %s189_s29, 4  ;;  %s191_s5 = int_to_ptr.hbm [resolvable:$true] %s190_s5 }
  0x1b   : > { %s3603_s9 = sshra.s32 %s191_s5, 4  ;;  %s3604_s9 = int_to_ptr.hbm [resolvable:$true] %s3603_s9 }
  0x1c   : > { %s3605_s10 = scalar_lea.hbm %s3604_s9, 192  ;;  %p3611_p11 = scmp.lt.s32.totalorder %s3604_s9, %s5549_s1 }
  0x1d   : > { %p3606_p7 = scmp.ne.s32.totalorder %s3604_s9, %s3605_s10  ;;  %p3612_p12 = scmp.lt.s32.totalorder %s3610_s13, %s3605_s10 }
  0x1f   : > { %p3608_p9 = pnand %p3607_p8, %p3606_p7  ;;  %p3613_p13 = por %p3612_p12, %p3611_p11 }
  0x21   : > { %p3609_p10 = pneg %p3608_p9 }
  0x23   : > { %p3614_p1 = pnand %p3613_p13, %p3609_p10 }
  0x25   : > { %3617 = shalt.err (!%p3614_p1)
}
  0x26   : > { %s5454_s21 = smov 128   ;;  %s5455_s23 = smov 64  }
  0x27   : > { %s5456_s25 = smov 4   ;;  %s3905_s27 = sadd.s32 4294967295, %s3797_s18  }
  0x28   : > { %3545 = dma.hbm_to_vmem [thread:$0]  (!%p3881_p6), %s191_s5, 3072, %s193_s7, %s3885_s8, %s5454_s21, %s5455_s23, %s5456_s25  }
  0x29   : > { %s2532_s28 = sadd.s32 4294967294, %s3797_s18   ;;  %p65_p2 = scmp.ne.s32.totalorder %s3789_s16, %s3785_s15 }
  0x2a   : > { %p66_p4 = scmp.eq.s32.totalorder %s3905_s27, 0  ;;  %p141_p5 = scmp.eq.s32.totalorder %s3905_s27, 1 }
  0x2b   : > { %p147_p7 = scmp.eq.s32.totalorder %s2532_s28, 1  ;;  %p2533_p9 = scmp.ge.s32.totalorder %s3797_s18, 1 }
  0x2c   : > { %p3915_p10 = por %p66_p4, %p65_p2  ;;  %p3922_p11 = por %p141_p5, %p59_p0 }
  0x2d   : > { %p3926_p12 = por %p147_p7, %p65_p2  ;;  %p154_p13 = scmp.lt.s32.totalorder %s3797_s18, 3 }
  0x2e   : > { %s5554_s0 = sld [smem:[#allocation72_spill]]  ;;  %s3802_s12 = smov [#allocation2]  }
  0x2f   : > { %p3934_p1 = pnand %p2533_p9, %p154_p13  ;;  %s167_s13 = sshll.u32 %s3802_s12, 4  ;;  %s168_s13 = int_to_ptr.vmem [resolvable:$true] %s167_s13 }
  0x30   : > { %s2537_s14 = sshll.u32 %s3872_s24, 1  ;;  %s2538_s20 = sshll.u32 %s3797_s18, 1 }
  0x31   : > { %p3538_p0 = pneg %p3934_p1  ;;  %s210_s7 = scalar_lea.hbm %s5451_s2, %s2538_s20 }
  0x32   : > { %s3803_s9 = smov 192   ;;  %s3804_s23 = smov 12  }
  0x33   : > { %p3539_p2 = pnand %p3538_p0, %p66_p4  ;;  %s212_s25 = sshll.u32 %s210_s7, 4  ;;  %s213_s25 = int_to_ptr.hbm [resolvable:$true] %s212_s25 }
  0x34   : > { %s165_s10 = sshll.u32 %s5554_s0, 4  ;;  %s206_s26 = scalar_lea.vmem [#allocation7], %s2537_s14  ;;  %s166_s10 = int_to_ptr.hbm [resolvable:$true] %s165_s10 }
  0x35   : > { %3541 = dma.hbm_to_vmem [thread:$0]  (!%p3539_p2), %s166_s10, 12288, %s168_s13, [#allocation3], %s3803_s9, %s3803_s9, %s3804_s23  }
  0x36   : > { %s214_s0 = sshll.u32 %s206_s26, 4  ;;  %s3663_s1 = sshra.s32 %s213_s25, 4  ;;  %s215_s0 = int_to_ptr.vmem [resolvable:$true] %s214_s0  ;;  %s3664_s1 = int_to_ptr.hbm [resolvable:$true] %s3663_s1 }
  0x37   : > { %s3665_s12 = scalar_lea.hbm %s3664_s1, 2  ;;  %s3670_s21 = scalar_lea.hbm %s5451_s2, 4 }
  0x38   : > { %p3666_p5 = scmp.ne.s32.totalorder %s3664_s1, %s3665_s12  ;;  %p3671_p13 = scmp.lt.s32.totalorder %s3664_s1, %s5451_s2 }
  0x39   : > { %p3672_p0 = scmp.lt.s32.totalorder %s3670_s21, %s3665_s12 }
  0x3a   : > { %p3668_p7 = pnand %p3666_p5, %p3607_p8 }
  0x3b   : > { %p3673_p2 = por %p3672_p0, %p3671_p13 }
  0x3c   : > { %p3669_p9 = pneg %p3668_p7 }
  0x3e   : > { %p3674_p3 = pnand %p3673_p2, %p3669_p9 }
  0x40   : > { %3677 = shalt.err (!%p3674_p3)
}
  0x41   : > { %3548 = dma.hbm_to_vmem [thread:$0]  (!%p3881_p6), %s213_s25, 32, %s215_s0, %s3885_s8  }
  0x42   : > { %s2539_s26 = sshll.u32 %s3872_s24, 8  ;;  %s5556_s23 = sshll.u32 %s3797_s18, 2 }
  0x43   : > { %s229_s10 = scalar_lea.hbm %s5452_s3, %s5556_s23  ;;  %s225_s1 = scalar_lea.vmem [#allocation8], %s2539_s26 }
  0x44   : > { %s230_s13 = sshll.u32 %s229_s10, 4  ;;  %s232_s14 = sshll.u32 %s225_s1, 4  ;;  %s231_s13 = int_to_ptr.hbm [resolvable:$true] %s230_s13  ;;  %s233_s14 = int_to_ptr.vmem [resolvable:$true] %s232_s14 }
  0x45   : > { %s222_s7 = scalar_lea.sflag [#allocation9], %s3872_s24  ;;  %s3693_s9 = sshra.s32 %s231_s13, 4  ;;  %s3694_s9 = int_to_ptr.hbm [resolvable:$true] %s3693_s9 }
  0x46   : > { %s3695_s12 = scalar_lea.hbm %s3694_s9, 256  ;;  %s3700_s25 = scalar_lea.hbm %s5452_s3, 512 }
  0x47   : > { %p3696_p3 = scmp.ne.s32.totalorder %s3694_s9, %s3695_s12  ;;  %p3701_p9 = scmp.lt.s32.totalorder %s3694_s9, %s5452_s3 }
  0x48   : > { %p3702_p13 = scmp.lt.s32.totalorder %s3700_s25, %s3695_s12 }
  0x49   : > { %p3698_p5 = pnand %p3696_p3, %p3607_p8 }
  0x4a   : > { %p3703_p0 = por %p3702_p13, %p3701_p9 }
  0x4b   : > { %p3699_p7 = pneg %p3698_p5 }
  0x4d   : > { %p3704_p2 = pnand %p3703_p0, %p3699_p7 }
  0x4f   : > { %3707 = shalt.err (!%p3704_p2)
}
  0x50   : > { %s5557_s24 = smov 4   ;;  %s5558_s28 = smov 64  }
  0x51   : > { %s5559_s26 = smov 128   ;;  %244 = sbr.rel (%p3934_p1) target bundleno = 852 (0x354), region = 36 }
  0x52   : > { %3551 = dma.hbm_to_vmem [thread:$0]  (!%p3881_p6), %s231_s13, 4096, %s233_s14, %s222_s7, %s5559_s26, %s5558_s28, %s5557_s24  }
  0x56   : > { %3768 = dma.done.wait (%p66_p4), [#allocation3], 12288  }
  0x57   : > { %3770 = vsyncadd (%p66_p4), [#allocation3], 4294955008  ;;  %s251_s23 = sand.u32 1, %s3905_s27   ;;  %s3988_s17 = sand.u32 1, %s3789_s16  }
  0x58   : > { %s3525_s30 = smul.u32 192, %s3988_s17  ;;  %s252_s22 = scalar_lea.sflag [#allocation6], %s251_s23 }
  0x5a   : > { %s3991_s10 = scalar_lea.vmem [#allocation5], %s3525_s30 }
  0x5b   : > { %3772 = dma.done.wait (%p3915_p10), %s252_s22, 3104  }
  0x5c   : > { %3774 = vsyncadd (%p3915_p10), %s252_s22, 4294964192  ;;  %s2543_s11 = sshll.u32 %s3988_s17, 1  ;;  %s2544_s13 = sshll.u32 %s3988_s17, 8 }
  0x5d   : > { %s3999_s1 = scalar_lea.vmem [#allocation7], %s2543_s11  ;;  %s272_s14 = scalar_lea.sflag [#allocation9], %s3988_s17 }
  0x5e   : > { %s4004_s7 = scalar_lea.vmem [#allocation8], %s2544_s13 }
  0x5f   : > { %3776 = dma.done.wait (%p3915_p10), %s272_s14, 4096  }
  0x60   : > { %3778 = vsyncadd (%p3915_p10), %s272_s14, 4294963200  ;;  %v3133_v0 = vld [vmem:[%s3991_s10 + $0x38] sm:$0xff]  ;;  %v3132_v3 = vld [vmem:[%s3991_s10 + $0x30] sm:$0xff]  ;;  %s4929_s29 = scalar_lea.vmem [#allocation10], %s2544_s13  ;;  %s3027_s9 = sshll.u32 %s3905_s27, 2 }
  0x61   : > { %v4012_v1 = vld [vmem:[%s3991_s10 + $0x78] sm:$0xff]  ;;  %1143 = vmatpush.bf16.msra.mxu0 %v3133_v0  ;;  %3500 = vmatpush.bf16.msra.mxu3 %v3133_v0  ;;  %v4021_v4 = vld [vmem:[%s3991_s10 + $0x70] sm:$0xff]  ;;  %v3131_v6 = vld [vmem:[%s3991_s10 + $0x28] sm:$0xff]  ;;  %s2400_s8 = scalar_lea.hbm %s5453_s4, %s3027_s9  ;;  %s2401_s25 = sshll.u32 %s4929_s29, 4  ;;  %s2402_s25 = int_to_ptr.vmem [resolvable:$true] %s2401_s25 }
  0x62   : > { %v4015_v2 = vld [vmem:[%s3991_s10 + $0xb8] sm:$0xff]  ;;  %1312 = vmatpush.bf16.msra.mxu1 %v4012_v1  ;;  %v4024_v5 = vld [vmem:[%s3991_s10 + $0xb0] sm:$0xff]  ;;  %v3139_v7 = vld [vmem:[%s3991_s10 + $0x68] sm:$0xff]  ;;  %s2403_s21 = sshll.u32 %s2400_s8, 4  ;;  %s2390_s27 = scalar_lea.sflag [#allocation4], %s3988_s17  ;;  %s2404_s21 = int_to_ptr.hbm [resolvable:$true] %s2403_s21 }
  0x63   : > { %1481 = vmatpush.bf16.msra.mxu2 %v4015_v2  ;;  %v4031_v8 = vld [vmem:[%s3991_s10 + $0xa8] sm:$0xff]  ;;  %v3130_v9 = vld [vmem:[%s3991_s10 + $0x20] sm:$0xff]  ;;  %v3129_v12 = vld [vmem:[%s3991_s10 + $0x18] sm:$0xff]  ;;  %s3737_s20 = sshra.s32 %s2404_s21, 4  ;;  %s3743_s23 = scalar_lea.hbm %s5453_s4, 512  ;;  %s3738_s20 = int_to_ptr.hbm [resolvable:$true] %s3737_s20 }
  0x64   : > { %v3138_v10 = vld [vmem:[%s3991_s10 + $0x60] sm:$0xff]  ;;  %v3137_v13 = vld [vmem:[%s3991_s10 + $0x58] sm:$0xff]  ;;  %v3128_v15 = vld [vmem:[%s3991_s10 + $0x10] sm:$0xff]  ;;  %s3739_s24 = scalar_lea.hbm %s3738_s20, 256  ;;  %p3744_p10 = scmp.lt.s32.totalorder %s3738_s20, %s5453_s4 }
  0x65   : > { %1144 = vmatpush.bf16.msra.mxu0 %v3132_v3  ;;  %3501 = vmatpush.bf16.msra.mxu3 %v3132_v3  ;;  %v4037_v11 = vld [vmem:[%s3991_s10 + $0xa0] sm:$0xff]  ;;  %v4043_v14 = vld [vmem:[%s3991_s10 + $0x98] sm:$0xff]  ;;  %v3136_v16 = vld [vmem:[%s3991_s10 + $0x50] sm:$0xff]  ;;  %p3740_p6 = scmp.ne.s32.totalorder %s3738_s20, %s3739_s24  ;;  %p3745_p1 = scmp.lt.s32.totalorder %s3743_s23, %s3739_s24 }
  0x66   : > { %1313 = vmatpush.bf16.msra.mxu1 %v4021_v4  ;;  %v4049_v17 = vld [vmem:[%s3991_s10 + $0x90] sm:$0xff]  ;;  %v3127_v18 = vld [vmem:[%s3991_s10 + $0x8] sm:$0xff]  ;;  %v3126_v21 = vld [vmem:[%s3991_s10] sm:$0xff] }
  0x67   : > { %1482 = vmatpush.bf16.msra.mxu2 %v4024_v5  ;;  %v3135_v19 = vld [vmem:[%s3991_s10 + $0x48] sm:$0xff]  ;;  %v3134_v22 = vld [vmem:[%s3991_s10 + $0x40] sm:$0xff]  ;;  %v2550_v29 = vld [vmem:[#allocation2 + $0xc] sm:$0xf0]  ;;  %p3741_p8 = pnand %p3740_p6, %p3922_p11  ;;  %p3746_p3 = por %p3745_p1, %p3744_p10 }
  0x68   : > { %v4055_v20 = vld [vmem:[%s3991_s10 + $0x88] sm:$0xff]  ;;  %v4060_v23 = vld [vmem:[%s3991_s10 + $0x80] sm:$0xff]  ;;  %v3032_v31 = vld [vmem:[#allocation2 + $0x10] sm:$0xf0] }
  0x69   : > { %1145 = vmatpush.bf16.msra.mxu0 %v3131_v6  ;;  %3502 = vmatpush.bf16.msra.mxu3 %v3131_v6  ;;  %v2548_v24 = vld [vmem:[#allocation2] sm:$0xf]  ;;  %v3031_v25 = vld [vmem:[#allocation2 + $0x8] sm:$0xf0]  ;;  %v3030_v28 = vld [vmem:[#allocation2 + $0x4] sm:$0xf]  ;;  %p3742_p4 = pneg %p3741_p8 }
  0x6a   : > { %1314 = vmatpush.bf16.msra.mxu1 %v3139_v7  ;;  %v2836_v26 = vld [vmem:[#allocation2 + $0x240] sm:$0xf]  ;;  %v3103_v27 = vld [vmem:[#allocation2 + $0x248] sm:$0xf0]  ;;  %v2556_v30 = vld [vmem:[#allocation2 + $0x8] sm:$0xf]  ;;  %v2549_v32 = vor.u32 %v3031_v25, %v2548_v24  ;;  %v2553_v34 = vor.u32 %v3030_v28, %v2550_v29 }
  0x6b   : > { %1483 = vmatpush.bf16.msra.mxu2 %v4031_v8  ;;  %v2837_v33 = vor.u32 %v3103_v27, %v2836_v26  ;;  %v2557_v35 = vor.u32 %v3032_v31, %v2556_v30  ;;  %v2560_v36 = vld [vmem:[#allocation2 + $0x18] sm:$0xf]  ;;  %v3034_v37 = vld [vmem:[#allocation2 + $0x20] sm:$0xf0]  ;;  %v3033_v40 = vld [vmem:[#allocation2 + $0x1c] sm:$0xf]  ;;  %p3747_p5 = pnand %p3746_p3, %p3742_p4 }
  0x6c   : > { %v2848_v38 = vld [vmem:[#allocation2 + $0x258] sm:$0xf]  ;;  %v3106_v39 = vld [vmem:[#allocation2 + $0x260] sm:$0xf0]  ;;  %v2562_v41 = vld [vmem:[#allocation2 + $0x24] sm:$0xf0]  ;;  %v2561_v44 = vor.u32 %v3034_v37, %v2560_v36 }
  0x6d   : > { %1146 = vmatpush.bf16.msra.mxu0 %v3130_v9  ;;  %3503 = vmatpush.bf16.msra.mxu3 %v3130_v9  ;;  %v2568_v42 = vld [vmem:[#allocation2 + $0x20] sm:$0xf]  ;;  %v3035_v43 = vld [vmem:[#allocation2 + $0x28] sm:$0xf0]  ;;  %v2849_v45 = vor.u32 %v3106_v39, %v2848_v38  ;;  %v2565_v46 = vor.u32 %v3033_v40, %v2562_v41  ;;  %v2572_v48 = vld [vmem:[#allocation2 + $0x30] sm:$0xf] }
  0x6e   : > { %1315 = vmatpush.bf16.msra.mxu1 %v3138_v10  ;;  %v2569_v47 = vor.u32 %v3035_v43, %v2568_v42  ;;  %v3037_v49 = vld [vmem:[#allocation2 + $0x38] sm:$0xf0]  ;;  %v2860_v50 = vld [vmem:[#allocation2 + $0x270] sm:$0xf]  ;;  %v3036_v52 = vld [vmem:[#allocation2 + $0x34] sm:$0xf] }
  0x6f   : > { %1484 = vmatpush.bf16.msra.mxu2 %v4037_v11  ;;  %v3109_v51 = vld [vmem:[#allocation2 + $0x278] sm:$0xf0]  ;;  %v2574_v53 = vld [vmem:[#allocation2 + $0x3c] sm:$0xf0]  ;;  %v2580_v54 = vld [vmem:[#allocation2 + $0x38] sm:$0xf]  ;;  %v2573_v56 = vor.u32 %v3037_v49, %v2572_v48 }
  0x70   : > { %v3038_v55 = vld [vmem:[#allocation2 + $0x40] sm:$0xf0]  ;;  %v2861_v57 = vor.u32 %v3109_v51, %v2860_v50  ;;  %v2577_v58 = vor.u32 %v3036_v52, %v2574_v53  ;;  %v2584_v60 = vld [vmem:[#allocation2 + $0x48] sm:$0xf]  ;;  %v3040_v61 = vld [vmem:[#allocation2 + $0x50] sm:$0xf0] }
  0x71   : > { %1147 = vmatpush.bf16.msra.mxu0 %v3129_v12  ;;  %3504 = vmatpush.bf16.msra.mxu3 %v3129_v12  ;;  %v2581_v59 = vor.u32 %v3038_v55, %v2580_v54  ;;  %v2872_v62 = vld [vmem:[#allocation2 + $0x288] sm:$0xf]  ;;  %v3112_v63 = vld [vmem:[#allocation2 + $0x290] sm:$0xf0]  ;;  %v3039_v0 = vld [vmem:[#allocation2 + $0x4c] sm:$0xf] }
  0x72   : > { %1316 = vmatpush.bf16.msra.mxu1 %v3137_v13  ;;  %v2592_v3 = vld [vmem:[#allocation2 + $0x50] sm:$0xf]  ;;  %v2873_v6 = vor.u32 %v3112_v63, %v2872_v62  ;;  %v3115_v12 = vld [vmem:[#allocation2 + $0x2a8] sm:$0xf0]  ;;  %v3118_v24 = vld [vmem:[#allocation2 + $0x2c0] sm:$0xf0] }
  0x73   : > { %1485 = vmatpush.bf16.msra.mxu2 %v4043_v14  ;;  %v3045_v25 = vld [vmem:[#allocation2 + $0x7c] sm:$0xf]  ;;  %v2610_v26 = vld [vmem:[#allocation2 + $0x84] sm:$0xf0]  ;;  %v2616_v27 = vld [vmem:[#allocation2 + $0x80] sm:$0xf] }
  0x74   : > { %v3047_v28 = vld [vmem:[#allocation2 + $0x88] sm:$0xf0]  ;;  %v2613_v31 = vor.u32 %v3045_v25, %v2610_v26  ;;  %v3048_v36 = vld [vmem:[#allocation2 + $0x94] sm:$0xf]  ;;  %v2622_v37 = vld [vmem:[#allocation2 + $0x9c] sm:$0xf0] }
  0x75   : > { %1148 = vmatpush.bf16.msra.mxu0 %v3128_v15  ;;  %3505 = vmatpush.bf16.msra.mxu3 %v3128_v15  ;;  %v2604_v15 = vld [vmem:[#allocation2 + $0x68] sm:$0xf]  ;;  %v2628_v38 = vld [vmem:[#allocation2 + $0x98] sm:$0xf]  ;;  %v3050_v39 = vld [vmem:[#allocation2 + $0xa0] sm:$0xf0]  ;;  %v2625_v42 = vor.u32 %v3048_v36, %v2622_v37 }
  0x76   : > { %1317 = vmatpush.bf16.msra.mxu1 %v3136_v16  ;;  %v2629_v43 = vor.u32 %v3050_v39, %v2628_v38  ;;  %v3051_v48 = vld [vmem:[#allocation2 + $0xac] sm:$0xf]  ;;  %v2634_v49 = vld [vmem:[#allocation2 + $0xb4] sm:$0xf0]  ;;  %v2640_v50 = vld [vmem:[#allocation2 + $0xb0] sm:$0xf] }
  0x77   : > { %1486 = vmatpush.bf16.msra.mxu2 %v4049_v17  ;;  %v3053_v51 = vld [vmem:[#allocation2 + $0xb8] sm:$0xf0]  ;;  %v2637_v54 = vor.u32 %v3051_v48, %v2634_v49  ;;  %v2652_v62 = vld [vmem:[#allocation2 + $0xc8] sm:$0xf]  ;;  %v3056_v63 = vld [vmem:[#allocation2 + $0xd0] sm:$0xf0] }
  0x78   : > { %v2641_v55 = vor.u32 %v3053_v51, %v2640_v50  ;;  %v2668_v37 = vld [vmem:[#allocation2 + $0xf0] sm:$0xf]  ;;  %v3061_v38 = vld [vmem:[#allocation2 + $0xf8] sm:$0xf0]  ;;  %v3060_v39 = vld [vmem:[#allocation2 + $0xf4] sm:$0xf] }
  0x79   : > { %1149 = vmatpush.bf16.msra.mxu0 %v3127_v18  ;;  %3506 = vmatpush.bf16.msra.mxu3 %v3127_v18 }
  0x7a   : > { %1318 = vmatpush.bf16.msra.mxu1 %v3135_v19 }
  0x7b   : > { %1487 = vmatpush.bf16.msra.mxu2 %v4055_v20 }
  0x7d   : > { %1150 = vmatpush.bf16.msra.mxu0 %v3126_v21  ;;  %3507 = vmatpush.bf16.msra.mxu3 %v3126_v21 }
  0x7e   : > { %1319 = vmatpush.bf16.msra.mxu1 %v3134_v22 }
  0x7f   : > { %1488 = vmatpush.bf16.msra.mxu2 %v4060_v23 }
  0x80   : > { %1151 = vmatmul.bf16.vlgmr.msra.gmra.mxu0 %v2549_v32  ;;  %1271 = vmatmul.bf16.vlgmr.msra.gmra.mxu3 %v2837_v33  ;;  %v2620_v32 = vld [vmem:[#allocation2 + $0x90] sm:$0xf]  ;;  %v3049_v33 = vld [vmem:[#allocation2 + $0x98] sm:$0xf0] }
  0x81   : > { %3508 = vmatpush.bf16.msrb.mxu3 %v4012_v1  ;;  %1320 = vmatmul.bf16.vlgmr.msra.gmra.mxu1 %v2553_v34  ;;  %v2586_v1 = vld [vmem:[#allocation2 + $0x54] sm:$0xf0]  ;;  %v2908_v34 = vld [vmem:[#allocation2 + $0x2d0] sm:$0xf]  ;;  %v2621_v40 = vor.u32 %v3049_v33, %v2620_v32 }
  0x82   : > { %1489 = vmatmul.bf16.vlgmr.msra.gmra.mxu2 %v2557_v35  ;;  %v3121_v35 = vld [vmem:[#allocation2 + $0x2d8] sm:$0xf0] }
  0x83   : > { %v2909_v41 = vor.u32 %v3121_v35, %v2908_v34 }
  0x85   : > { %3509 = vmatpush.bf16.msrb.mxu3 %v4021_v4  ;;  %v3041_v4 = vld [vmem:[#allocation2 + $0x58] sm:$0xf0] }
  0x86   : > { %v2593_v9 = vor.u32 %v3041_v4, %v2592_v3 }
  0x89   : > { %3510 = vmatpush.bf16.msrb.mxu3 %v3139_v7  ;;  %v2589_v7 = vor.u32 %v3039_v0, %v2586_v1 }
  0x8d   : > { %3511 = vmatpush.bf16.msrb.mxu3 %v3138_v10  ;;  %v2884_v10 = vld [vmem:[#allocation2 + $0x2a0] sm:$0xf] }
  0x90   : > { %1156 = vmatmul.bf16.gmra.mxu0 %v2561_v44  ;;  %1276 = vmatmul.bf16.gmra.mxu3 %v2849_v45  ;;  %v2632_v44 = vld [vmem:[#allocation2 + $0xa8] sm:$0xf]  ;;  %v3052_v45 = vld [vmem:[#allocation2 + $0xb0] sm:$0xf0] }
  0x91   : > { %3512 = vmatpush.bf16.msrb.mxu3 %v3137_v13  ;;  %1325 = vmatmul.bf16.gmra.mxu1 %v2565_v46  ;;  %v3042_v13 = vld [vmem:[#allocation2 + $0x64] sm:$0xf]  ;;  %v2920_v46 = vld [vmem:[#allocation2 + $0x2e8] sm:$0xf]  ;;  %v2633_v52 = vor.u32 %v3052_v45, %v2632_v44 }
  0x92   : > { %1494 = vmatmul.bf16.gmra.mxu2 %v2569_v47  ;;  %v3124_v47 = vld [vmem:[#allocation2 + $0x2f0] sm:$0xf0]  ;;  %v3062_v44 = vld [vmem:[#allocation2 + $0x100] sm:$0xf0] }
  0x93   : > { %v2921_v53 = vor.u32 %v3124_v47, %v2920_v46  ;;  %v2669_v47 = vor.u32 %v3061_v38, %v2668_v37 }
  0x95   : > { %3513 = vmatpush.bf16.msrb.mxu3 %v3136_v16  ;;  %v3044_v16 = vld [vmem:[#allocation2 + $0x70] sm:$0xf0] }
  0x96   : > { %v2605_v21 = vor.u32 %v3044_v16, %v2604_v15  ;;  %v3058_v15 = vld [vmem:[#allocation2 + $0xe0] sm:$0xf0]  ;;  %v3057_v16 = vld [vmem:[#allocation2 + $0xdc] sm:$0xf] }
  0x99   : > { %3514 = vmatpush.bf16.msrb.mxu3 %v3135_v19 }
  0x9d   : > { %3515 = vmatpush.bf16.msrb.mxu3 %v3134_v22  ;;  %v2896_v22 = vld [vmem:[#allocation2 + $0x2b8] sm:$0xf] }
  0x9e   : > { %v2897_v30 = vor.u32 %v3118_v24, %v2896_v22 }
  0xa0   : > { %1161 = vmatmul.bf16.gmra.mxu0 %v2573_v56  ;;  %1281 = vmatmul.bf16.gmra.mxu3 %v2861_v57  ;;  %v2644_v56 = vld [vmem:[#allocation2 + $0xc0] sm:$0xf]  ;;  %v3055_v57 = vld [vmem:[#allocation2 + $0xc8] sm:$0xf0] }
  0xa1   : > { %3516 = vmatpush.bf16.msra.mxu3 %v4015_v2  ;;  %1330 = vmatmul.bf16.gmra.mxu1 %v2577_v58  ;;  %v2585_v2 = vor.u32 %v3040_v61, %v2584_v60  ;;  %v3054_v58 = vld [vmem:[#allocation2 + $0xc4] sm:$0xf]  ;;  %v2838_v60 = vld [vmem:[#allocation2 + $0x24c] sm:$0xf0]  ;;  %v2645_v0 = vor.u32 %v3055_v57, %v2644_v56 }
  0xa2   : > { %1499 = vmatmul.bf16.gmra.mxu2 %v2581_v59  ;;  %v3102_v59 = vld [vmem:[#allocation2 + $0x244] sm:$0xf]  ;;  %v2646_v61 = vld [vmem:[#allocation2 + $0xcc] sm:$0xf0] }
  0xa3   : > { %v2841_v1 = vor.u32 %v3102_v59, %v2838_v60  ;;  %v2649_v4 = vor.u32 %v3054_v58, %v2646_v61  ;;  %v2680_v61 = vld [vmem:[#allocation2 + $0x108] sm:$0xf] }
  0xa5   : > { %3517 = vmatpush.bf16.msra.mxu3 %v4024_v5  ;;  %v2596_v5 = vld [vmem:[#allocation2 + $0x60] sm:$0xf] }
  0xa9   : > { %3518 = vmatpush.bf16.msra.mxu3 %v4031_v8  ;;  %v3043_v8 = vld [vmem:[#allocation2 + $0x68] sm:$0xf0] }
  0xaa   : > { %v2597_v18 = vor.u32 %v3043_v8, %v2596_v5 }
  0xad   : > { %3519 = vmatpush.bf16.msra.mxu3 %v4037_v11  ;;  %v2598_v11 = vld [vmem:[#allocation2 + $0x6c] sm:$0xf0] }
  0xae   : > { %v2601_v19 = vor.u32 %v3042_v13, %v2598_v11  ;;  %v2656_v11 = vld [vmem:[#allocation2 + $0xd8] sm:$0xf] }
  0xaf   : > { %v2657_v24 = vor.u32 %v3058_v15, %v2656_v11 }
  0xb0   : > { %1166 = vmatmul.bf16.gmra.mxu0 %v2585_v2  ;;  %1286 = vmatmul.bf16.gmra.mxu3 %v2873_v6  ;;  %v2653_v2 = vor.u32 %v3056_v63, %v2652_v62  ;;  %v3064_v62 = vld [vmem:[#allocation2 + $0x110] sm:$0xf0]  ;;  %v3063_v63 = vld [vmem:[#allocation2 + $0x10c] sm:$0xf] }
  0xb1   : > { %3520 = vmatpush.bf16.msra.mxu3 %v4043_v14  ;;  %1335 = vmatmul.bf16.gmra.mxu1 %v2589_v7  ;;  %v2885_v14 = vor.u32 %v3115_v12, %v2884_v10 }
  0xb2   : > { %1504 = vmatmul.bf16.gmra.mxu2 %v2593_v9 }
  0xb5   : > { %3521 = vmatpush.bf16.msra.mxu3 %v4049_v17  ;;  %v2608_v17 = vld [vmem:[#allocation2 + $0x78] sm:$0xf] }
  0xb9   : > { %3522 = vmatpush.bf16.msra.mxu3 %v4055_v20  ;;  %v3046_v20 = vld [vmem:[#allocation2 + $0x80] sm:$0xf0] }
  0xba   : > { %v2609_v29 = vor.u32 %v3046_v20, %v2608_v17  ;;  %v3059_v17 = vld [vmem:[#allocation2 + $0xe8] sm:$0xf0] }
  0xbd   : > { %3523 = vmatpush.bf16.msra.mxu3 %v4060_v23  ;;  %v2617_v23 = vor.u32 %v3047_v28, %v2616_v27 }
  0xc0   : > { %1171 = vmatmul.bf16.gmra.mxu0 %v2597_v18  ;;  %1291 = vmatmul.bf16.gmra.mxu3 %v2885_v14  ;;  %v3105_v18 = vld [vmem:[#allocation2 + $0x25c] sm:$0xf]  ;;  %v2850_v14 = vld [vmem:[#allocation2 + $0x264] sm:$0xf0] }
  0xc1   : > { %1340 = vmatmul.bf16.gmra.mxu1 %v2601_v19  ;;  %v2658_v19 = vld [vmem:[#allocation2 + $0xe4] sm:$0xf0]  ;;  %v2853_v25 = vor.u32 %v3105_v18, %v2850_v14 }
  0xc2   : > { %1509 = vmatmul.bf16.gmra.mxu2 %v2605_v21  ;;  %v2664_v21 = vld [vmem:[#allocation2 + $0xe0] sm:$0xf]  ;;  %v2661_v28 = vor.u32 %v3057_v16, %v2658_v19 }
  0xd0   : > { %1176 = vmatmul.bf16.gmra.mxu0 %v2609_v29  ;;  %1296 = vmatmul.bf16.gmra.mxu3 %v2897_v30  ;;  %v2665_v29 = vor.u32 %v3059_v17, %v2664_v21 }
  0xd1   : > { %1345 = vmatmul.bf16.gmra.mxu1 %v2613_v31 }
  0xd2   : > { %1514 = vmatmul.bf16.gmra.mxu2 %v2617_v23 }
  0xe0   : > { %1181 = vmatmul.bf16.gmra.mxu0 %v2621_v40  ;;  %1301 = vmatmul.bf16.gmra.mxu3 %v2909_v41  ;;  %v3108_v40 = vld [vmem:[#allocation2 + $0x274] sm:$0xf]  ;;  %v2862_v41 = vld [vmem:[#allocation2 + $0x27c] sm:$0xf0] }
  0xe1   : > { %1350 = vmatmul.bf16.gmra.mxu1 %v2625_v42  ;;  %v2670_v42 = vld [vmem:[#allocation2 + $0xfc] sm:$0xf0]  ;;  %v2865_v48 = vor.u32 %v3108_v40, %v2862_v41 }
  0xe2   : > { %1519 = vmatmul.bf16.gmra.mxu2 %v2629_v43  ;;  %v2676_v43 = vld [vmem:[#allocation2 + $0xf8] sm:$0xf]  ;;  %v2673_v51 = vor.u32 %v3060_v39, %v2670_v42 }
  0xf0   : > { %1186 = vmatmul.bf16.gmra.mxu0 %v2633_v52  ;;  %1306 = vmatmul.bf16.gmra.mxu3 %v2921_v53  ;;  %v2677_v52 = vor.u32 %v3062_v44, %v2676_v43 }
  0xf1   : > { %1355 = vmatmul.bf16.gmra.mxu1 %v2637_v54 }
  0xf2   : > { %1524 = vmatmul.bf16.gmra.mxu2 %v2641_v55 }
  0xfd   : > { %v1152_v3 = vpop.f32.mrf.mxu0 }
  0xfe   : > { %v1321_v6 = vpop.f32.mrf.mxu1 }
  0xff   : > { %v1322_v7 = vadd.f32 %v1321_v6, %v1152_v3  ;;  %v2682_v3 = vld [vmem:[#allocation2 + $0x114] sm:$0xf0] }
 0x100   : > { %1191 = vmatmul.bf16.gmra.mxu0 %v2645_v0  ;;  %1440 = vmatmul.bf16.vlgmr.msrb.gmra.mxu3 %v2841_v1  ;;  %v3111_v0 = vld [vmem:[#allocation2 + $0x28c] sm:$0xf]  ;;  %v2874_v1 = vld [vmem:[#allocation2 + $0x294] sm:$0xf0]  ;;  %v2685_v11 = vor.u32 %v3063_v63, %v2682_v3 }
 0x101   : > { %1360 = vmatmul.bf16.gmra.mxu1 %v2649_v4  ;;  %v2688_v4 = vld [vmem:[#allocation2 + $0x110] sm:$0xf] }
 0x102   : > { %1529 = vmatmul.bf16.gmra.mxu2 %v2653_v2  ;;  %v3065_v2 = vld [vmem:[#allocation2 + $0x118] sm:$0xf0] }
 0x103   : > { %v4074_v9 = vpop.f32.mrf.mxu3  ;;  %v2689_v15 = vor.u32 %v3065_v2, %v2688_v4 }
 0x105   : > { %v1490_v5 = vpop.f32.mrf.mxu2  ;;  %v1154_v10 = vpop.f32.mrf.mxu0 }
 0x106   : > { %v4076_v8 = vadd.f32 %v1490_v5, %v1322_v7  ;;  %v1323_v12 = vpop.f32.mrf.mxu1  ;;  %v2681_v5 = vor.u32 %v3064_v62, %v2680_v61  ;;  %v2712_v61 = vld [vmem:[#allocation2 + $0x140] sm:$0xf]  ;;  %v3071_v62 = vld [vmem:[#allocation2 + $0x148] sm:$0xf0] }
 0x107   : > { %v1324_v13 = vadd.f32 %v1323_v12, %v1154_v10  ;;  %v2877_v10 = vor.u32 %v3111_v0, %v2874_v1 }
 0x10b   : > { %v4078_v20 = vpop.f32.mrf.mxu3 }
 0x10d   : > { %v1492_v22 = vpop.f32.mrf.mxu2  ;;  %v1157_v27 = vpop.f32.mrf.mxu0 }
 0x10e   : > { %v4080_v26 = vadd.f32 %v1492_v22, %v1324_v13  ;;  %v1326_v30 = vpop.f32.mrf.mxu1 }
 0x10f   : > { %v1327_v31 = vadd.f32 %v1326_v30, %v1157_v27  ;;  %v3067_v27 = vld [vmem:[#allocation2 + $0x128] sm:$0xf0]  ;;  %v2886_v30 = vld [vmem:[#allocation2 + $0x2ac] sm:$0xf0] }
 0x110   : > { %1196 = vmatmul.bf16.gmra.mxu0 %v2657_v24  ;;  %1445 = vmatmul.bf16.gmra.mxu3 %v2853_v25  ;;  %v2692_v25 = vld [vmem:[#allocation2 + $0x120] sm:$0xf] }
 0x111   : > { %1365 = vmatmul.bf16.gmra.mxu1 %v2661_v28  ;;  %v3066_v28 = vld [vmem:[#allocation2 + $0x124] sm:$0xf]  ;;  %v2693_v37 = vor.u32 %v3067_v27, %v2692_v25  ;;  %v3072_v25 = vld [vmem:[#allocation2 + $0x154] sm:$0xf] }
 0x112   : > { %1534 = vmatmul.bf16.gmra.mxu2 %v2665_v29  ;;  %v3114_v29 = vld [vmem:[#allocation2 + $0x2a4] sm:$0xf]  ;;  %v3120_v27 = vld [vmem:[#allocation2 + $0x2d4] sm:$0xf] }
 0x113   : > { %v4082_v23 = vpop.f32.mrf.mxu3  ;;  %v2889_v38 = vor.u32 %v3114_v29, %v2886_v30  ;;  %v2718_v29 = vld [vmem:[#allocation2 + $0x15c] sm:$0xf0]  ;;  %v2724_v30 = vld [vmem:[#allocation2 + $0x158] sm:$0xf] }
 0x115   : > { %v1495_v32 = vpop.f32.mrf.mxu2  ;;  %v1159_v34 = vpop.f32.mrf.mxu0 }
 0x116   : > { %v4084_v33 = vadd.f32 %v1495_v32, %v1327_v31  ;;  %v1328_v35 = vpop.f32.mrf.mxu1  ;;  %v2694_v31 = vld [vmem:[#allocation2 + $0x12c] sm:$0xf0]  ;;  %v2700_v32 = vld [vmem:[#allocation2 + $0x128] sm:$0xf] }
 0x117   : > { %v1329_v36 = vadd.f32 %v1328_v35, %v1159_v34  ;;  %v3068_v34 = vld [vmem:[#allocation2 + $0x130] sm:$0xf0]  ;;  %v2697_v41 = vor.u32 %v3066_v28, %v2694_v31  ;;  %v2910_v28 = vld [vmem:[#allocation2 + $0x2dc] sm:$0xf0]  ;;  %v3074_v31 = vld [vmem:[#allocation2 + $0x160] sm:$0xf0] }
 0x118   : > { %v2701_v42 = vor.u32 %v3068_v34, %v2700_v32 }
 0x11b   : > { %v4086_v45 = vpop.f32.mrf.mxu3 }
 0x11d   : > { %v1497_v46 = vpop.f32.mrf.mxu2  ;;  %v1162_v50 = vpop.f32.mrf.mxu0 }
 0x11e   : > { %v4088_v49 = vadd.f32 %v1497_v46, %v1329_v36  ;;  %v1331_v53 = vpop.f32.mrf.mxu1 }
 0x11f   : > { %v1332_v54 = vadd.f32 %v1331_v53, %v1162_v50  ;;  %v2704_v53 = vld [vmem:[#allocation2 + $0x138] sm:$0xf] }
 0x120   : > { %1201 = vmatmul.bf16.gmra.mxu0 %v2669_v47  ;;  %1450 = vmatmul.bf16.gmra.mxu3 %v2865_v48 }
 0x121   : > { %1370 = vmatmul.bf16.gmra.mxu1 %v2673_v51 }
 0x122   : > { %1539 = vmatmul.bf16.gmra.mxu2 %v2677_v52 }
 0x123   : > { %v4090_v55 = vpop.f32.mrf.mxu3 }
 0x125   : > { %v1500_v56 = vpop.f32.mrf.mxu2  ;;  %v1164_v58 = vpop.f32.mrf.mxu0 }
 0x126   : > { %v4092_v57 = vadd.f32 %v1500_v56, %v1332_v54  ;;  %v1333_v59 = vpop.f32.mrf.mxu1  ;;  %v3070_v54 = vld [vmem:[#allocation2 + $0x140] sm:$0xf0]  ;;  %v3069_v56 = vld [vmem:[#allocation2 + $0x13c] sm:$0xf] }
 0x127   : > { %v1334_v60 = vadd.f32 %v1333_v59, %v1164_v58  ;;  %v3117_v58 = vld [vmem:[#allocation2 + $0x2bc] sm:$0xf]  ;;  %v2898_v59 = vld [vmem:[#allocation2 + $0x2c4] sm:$0xf0]  ;;  %v2705_v1 = vor.u32 %v3070_v54, %v2704_v53 }
 0x128   : > { %v2901_v3 = vor.u32 %v3117_v58, %v2898_v59  ;;  %v3076_v58 = vld [vmem:[#allocation2 + $0x170] sm:$0xf0]  ;;  %v3075_v59 = vld [vmem:[#allocation2 + $0x16c] sm:$0xf] }
 0x12b   : > { %v4094_v6 = vpop.f32.mrf.mxu3 }
 0x12d   : > { %v1502_v7 = vpop.f32.mrf.mxu2  ;;  %v1167_v13 = vpop.f32.mrf.mxu0 }
 0x12e   : > { %v4096_v12 = vadd.f32 %v1502_v7, %v1334_v60  ;;  %v1336_v16 = vpop.f32.mrf.mxu1  ;;  %v2706_v60 = vld [vmem:[#allocation2 + $0x144] sm:$0xf0] }
 0x12f   : > { %v1337_v18 = vadd.f32 %v1336_v16, %v1167_v13  ;;  %v2709_v7 = vor.u32 %v3069_v56, %v2706_v60  ;;  %v2728_v56 = vld [vmem:[#allocation2 + $0x168] sm:$0xf]  ;;  %v3123_v60 = vld [vmem:[#allocation2 + $0x2ec] sm:$0xf] }
 0x130   : > { %1206 = vmatmul.bf16.gmra.mxu0 %v2681_v5  ;;  %1455 = vmatmul.bf16.gmra.mxu3 %v2877_v10  ;;  %v2713_v5 = vor.u32 %v3071_v62, %v2712_v61  ;;  %v2922_v61 = vld [vmem:[#allocation2 + $0x2f4] sm:$0xf0] }
 0x131   : > { %1375 = vmatmul.bf16.gmra.mxu1 %v2685_v11  ;;  %v2730_v62 = vld [vmem:[#allocation2 + $0x174] sm:$0xf0] }
 0x132   : > { %1544 = vmatmul.bf16.gmra.mxu2 %v2689_v15 }
 0x133   : > { %v4098_v14 = vpop.f32.mrf.mxu3 }
 0x134   : > { %5560 = vst [vmem:[#allocation17_spill] sm:$0xff] %v4098_v14 }
 0x135   : > { %v1505_v19 = vpop.f32.mrf.mxu2  ;;  %v1169_v17 = vpop.f32.mrf.mxu0 }
 0x136   : > { %v4100_v21 = vadd.f32 %v1505_v19, %v1337_v18  ;;  %v1338_v22 = vpop.f32.mrf.mxu1 }
 0x137   : > { %v1339_v24 = vadd.f32 %v1338_v22, %v1169_v17  ;;  %v2716_v22 = vld [vmem:[#allocation2 + $0x150] sm:$0xf] }
 0x13b   : > { %v4102_v35 = vpop.f32.mrf.mxu3 }
 0x13c   : > { %5561 = vst [vmem:[#allocation18_spill] sm:$0xff] %v4102_v35 }
 0x13d   : > { %v1507_v36 = vpop.f32.mrf.mxu2  ;;  %v1172_v40 = vpop.f32.mrf.mxu0 }
 0x13e   : > { %v4104_v39 = vadd.f32 %v1507_v36, %v1339_v24  ;;  %v1341_v43 = vpop.f32.mrf.mxu1  ;;  %v3073_v24 = vld [vmem:[#allocation2 + $0x158] sm:$0xf0] }
 0x13f   : > { %v1342_v44 = vadd.f32 %v1341_v43, %v1172_v40  ;;  %v2717_v36 = vor.u32 %v3073_v24, %v2716_v22 }
 0x140   : > { %5562 = vst [vmem:[#allocation19_spill] sm:$0xff] %v4104_v39  ;;  %1211 = vmatmul.bf16.gmra.mxu0 %v2693_v37  ;;  %1460 = vmatmul.bf16.gmra.mxu3 %v2889_v38  ;;  %v2913_v37 = vor.u32 %v3120_v27, %v2910_v28 }
 0x141   : > { %1380 = vmatmul.bf16.gmra.mxu1 %v2697_v41  ;;  %v2721_v41 = vor.u32 %v3072_v25, %v2718_v29 }
 0x142   : > { %1549 = vmatmul.bf16.gmra.mxu2 %v2701_v42  ;;  %v2725_v42 = vor.u32 %v3074_v31, %v2724_v30  ;;  %v2740_v30 = vld [vmem:[#allocation2 + $0x180] sm:$0xf]  ;;  %v3079_v31 = vld [vmem:[#allocation2 + $0x188] sm:$0xf0] }
 0x143   : > { %v4106_v46 = vpop.f32.mrf.mxu3 }
 0x144   : > { %5563 = vst [vmem:[#allocation20_spill] sm:$0xff] %v4106_v46 }
 0x145   : > { %v1510_v47 = vpop.f32.mrf.mxu2  ;;  %v1174_v50 = vpop.f32.mrf.mxu0 }
 0x146   : > { %v4108_v48 = vadd.f32 %v1510_v47, %v1342_v44  ;;  %v1343_v51 = vpop.f32.mrf.mxu1 }
 0x147   : > { %v1344_v52 = vadd.f32 %v1343_v51, %v1174_v50 }
 0x148   : > { %5564 = vst [vmem:[#allocation21_spill] sm:$0xff] %v4108_v48 }
 0x14b   : > { %v4110_v63 = vpop.f32.mrf.mxu3 }
 0x14c   : > { %5565 = vst [vmem:[#allocation22_spill] sm:$0xff] %v4110_v63 }
 0x14d   : > { %v1512_v0 = vpop.f32.mrf.mxu2  ;;  %v1177_v2 = vpop.f32.mrf.mxu0 }
 0x14e   : > { %v4112_v4 = vadd.f32 %v1512_v0, %v1344_v52  ;;  %v1346_v10 = vpop.f32.mrf.mxu1  ;;  %v2736_v0 = vld [vmem:[#allocation2 + $0x170] sm:$0xf] }
 0x14f   : > { %v1347_v13 = vadd.f32 %v1346_v10, %v1177_v2 }
 0x150   : > { %5566 = vst [vmem:[#allocation23_spill] sm:$0xff] %v4112_v4  ;;  %1216 = vmatmul.bf16.gmra.mxu0 %v2705_v1  ;;  %1465 = vmatmul.bf16.gmra.mxu3 %v2901_v3  ;;  %v3077_v1 = vld [vmem:[#allocation2 + $0x178] sm:$0xf0] }
 0x151   : > { %1385 = vmatmul.bf16.gmra.mxu1 %v2709_v7  ;;  %v2729_v7 = vor.u32 %v3076_v58, %v2728_v56 }
 0x152   : > { %1554 = vmatmul.bf16.gmra.mxu2 %v2713_v5  ;;  %v2925_v5 = vor.u32 %v3123_v60, %v2922_v61 }
 0x153   : > { %v4114_v11 = vpop.f32.mrf.mxu3 }
 0x154   : > { %5567 = vst [vmem:[#allocation24_spill] sm:$0xff] %v4114_v11 }
 0x155   : > { %v1515_v15 = vpop.f32.mrf.mxu2  ;;  %v1179_v18 = vpop.f32.mrf.mxu0 }
 0x156   : > { %v4116_v16 = vadd.f32 %v1515_v15, %v1347_v13  ;;  %v1348_v19 = vpop.f32.mrf.mxu1  ;;  %v2733_v15 = vor.u32 %v3075_v59, %v2730_v62 }
 0x157   : > { %v1349_v17 = vadd.f32 %v1348_v19, %v1179_v18  ;;  %v2737_v18 = vor.u32 %v3077_v1, %v2736_v0 }
 0x158   : > { %5568 = vst [vmem:[#allocation25_spill] sm:$0xff] %v4116_v16 }
 0x15b   : > { %v4118_v32 = vpop.f32.mrf.mxu3 }
 0x15c   : > { %5569 = vst [vmem:[#allocation26_spill] sm:$0xff] %v4118_v32 }
 0x15d   : > { %v1517_v34 = vpop.f32.mrf.mxu2  ;;  %v1182_v40 = vpop.f32.mrf.mxu0 }
 0x15e   : > { %v4120_v38 = vadd.f32 %v1517_v34, %v1349_v17  ;;  %v1351_v43 = vpop.f32.mrf.mxu1  ;;  %v3078_v34 = vld [vmem:[#allocation2 + $0x184] sm:$0xf] }
 0x15f   : > { %v1352_v44 = vadd.f32 %v1351_v43, %v1182_v40  ;;  %v2742_v40 = vld [vmem:[#allocation2 + $0x18c] sm:$0xf0] }
 0x160   : > { %5570 = vst [vmem:[#allocation27_spill] sm:$0xff] %v4120_v38  ;;  %1221 = vmatmul.bf16.gmra.mxu0 %v2717_v36  ;;  %1470 = vmatmul.bf16.gmra.mxu3 %v2913_v37  ;;  %v2844_v36 = vld [vmem:[#allocation2 + $0x248] sm:$0xf]  ;;  %v3104_v37 = vld [vmem:[#allocation2 + $0x250] sm:$0xf0]  ;;  %v2745_v56 = vor.u32 %v3078_v34, %v2742_v40 }
 0x161   : > { %1390 = vmatmul.bf16.gmra.mxu1 %v2721_v41  ;;  %v2748_v41 = vld [vmem:[#allocation2 + $0x188] sm:$0xf] }
 0x162   : > { %1559 = vmatmul.bf16.gmra.mxu2 %v2725_v42  ;;  %v3080_v42 = vld [vmem:[#allocation2 + $0x190] sm:$0xf0] }
 0x163   : > { %v4122_v47 = vpop.f32.mrf.mxu3  ;;  %v2749_v58 = vor.u32 %v3080_v42, %v2748_v41 }
 0x164   : > { %5571 = vst [vmem:[#allocation28_spill] sm:$0xff] %v4122_v47 }
 0x165   : > { %v1520_v50 = vpop.f32.mrf.mxu2  ;;  %v1184_v52 = vpop.f32.mrf.mxu0 }
 0x166   : > { %v4124_v51 = vadd.f32 %v1520_v50, %v1352_v44  ;;  %v1353_v53 = vpop.f32.mrf.mxu1  ;;  %v2741_v50 = vor.u32 %v3079_v31, %v2740_v30 }
 0x167   : > { %v1354_v54 = vadd.f32 %v1353_v53, %v1184_v52  ;;  %v2845_v52 = vor.u32 %v3104_v37, %v2844_v36 }
 0x168   : > { %5572 = vst [vmem:[#allocation29_spill] sm:$0xff] %v4124_v51 }
 0x16b   : > { %v4126_v3 = vpop.f32.mrf.mxu3 }
 0x16c   : > { %5573 = vst [vmem:[#allocation30_spill] sm:$0xff] %v4126_v3 }
 0x16d   : > { %v1522_v2 = vpop.f32.mrf.mxu2  ;;  %v1187_v13 = vpop.f32.mrf.mxu0 }
 0x16e   : > { %v4128_v10 = vadd.f32 %v1522_v2, %v1354_v54  ;;  %v1356_v19 = vpop.f32.mrf.mxu1 }
 0x16f   : > { %v1357_v17 = vadd.f32 %v1356_v19, %v1187_v13  ;;  %v3082_v13 = vld [vmem:[#allocation2 + $0x1a0] sm:$0xf0]  ;;  %v3107_v19 = vld [vmem:[#allocation2 + $0x268] sm:$0xf0] }
 0x170   : > { %5574 = vst [vmem:[#allocation31_spill] sm:$0xff] %v4128_v10  ;;  %1226 = vmatmul.bf16.gmra.mxu0 %v2729_v7  ;;  %1475 = vmatmul.bf16.gmra.mxu3 %v2925_v5  ;;  %v2752_v5 = vld [vmem:[#allocation2 + $0x198] sm:$0xf] }
 0x171   : > { %1395 = vmatmul.bf16.gmra.mxu1 %v2733_v15  ;;  %v3081_v15 = vld [vmem:[#allocation2 + $0x19c] sm:$0xf]  ;;  %v2753_v30 = vor.u32 %v3082_v13, %v2752_v5  ;;  %v2772_v5 = vld [vmem:[#allocation2 + $0x1b8] sm:$0xf]  ;;  %v3086_v13 = vld [vmem:[#allocation2 + $0x1c0] sm:$0xf0] }
 0x172   : > { %1564 = vmatmul.bf16.gmra.mxu2 %v2737_v18  ;;  %v2856_v18 = vld [vmem:[#allocation2 + $0x260] sm:$0xf] }
 0x173   : > { %v4130_v22 = vpop.f32.mrf.mxu3  ;;  %v2857_v31 = vor.u32 %v3107_v19, %v2856_v18 }
 0x174   : > { %5575 = vst [vmem:[#allocation32_spill] sm:$0xff] %v4130_v22 }
 0x175   : > { %v1525_v24 = vpop.f32.mrf.mxu2  ;;  %v1189_v27 = vpop.f32.mrf.mxu0 }
 0x176   : > { %v4132_v25 = vadd.f32 %v1525_v24, %v1357_v17  ;;  %v1358_v28 = vpop.f32.mrf.mxu1  ;;  %v2754_v17 = vld [vmem:[#allocation2 + $0x1a4] sm:$0xf0]  ;;  %v2760_v24 = vld [vmem:[#allocation2 + $0x1a0] sm:$0xf] }
 0x177   : > { %v1359_v29 = vadd.f32 %v1358_v28, %v1189_v27  ;;  %v3083_v27 = vld [vmem:[#allocation2 + $0x1a8] sm:$0xf0]  ;;  %v2757_v37 = vor.u32 %v3081_v15, %v2754_v17 }
 0x178   : > { %5576 = vst [vmem:[#allocation33_spill] sm:$0xff] %v4132_v25  ;;  %v2761_v40 = vor.u32 %v3083_v27, %v2760_v24 }
 0x17b   : > { %v4134_v43 = vpop.f32.mrf.mxu3 }
 0x17c   : > { %5577 = vst [vmem:[#allocation34_spill] sm:$0xff] %v4134_v43 }
 0x17d   : > { %v1527_v44 = vpop.f32.mrf.mxu2  ;;  %v1192_v54 = vpop.f32.mrf.mxu0 }
 0x17e   : > { %v4136_v53 = vadd.f32 %v1527_v44, %v1359_v29  ;;  %v1361_v59 = vpop.f32.mrf.mxu1 }
 0x17f   : > { %v1362_v60 = vadd.f32 %v1361_v59, %v1192_v54  ;;  %v2764_v59 = vld [vmem:[#allocation2 + $0x1b0] sm:$0xf] }
 0x180   : > { %5578 = vst [vmem:[#allocation35_spill] sm:$0xff] %v4136_v53  ;;  %1231 = vmatmul.bf16.gmra.mxu0 %v2741_v50  ;;  %1609 = vmatmul.bf16.vlgmr.msra.gmra.mxu3 %v2845_v52 }
 0x181   : > { %1400 = vmatmul.bf16.gmra.mxu1 %v2745_v56 }
 0x182   : > { %1569 = vmatmul.bf16.gmra.mxu2 %v2749_v58 }
 0x183   : > { %v4138_v61 = vpop.f32.mrf.mxu3 }
 0x185   : > { %v1530_v62 = vpop.f32.mrf.mxu2  ;;  %v1194_v1 = vpop.f32.mrf.mxu0 }
 0x186   : > { %v4140_v0 = vadd.f32 %v1530_v62, %v1362_v60  ;;  %v1363_v2 = vpop.f32.mrf.mxu1  ;;  %v3085_v60 = vld [vmem:[#allocation2 + $0x1b8] sm:$0xf0]  ;;  %v3084_v62 = vld [vmem:[#allocation2 + $0x1b4] sm:$0xf] }
 0x187   : > { %v1364_v7 = vadd.f32 %v1363_v2, %v1194_v1  ;;  %v2868_v1 = vld [vmem:[#allocation2 + $0x278] sm:$0xf]  ;;  %v3110_v2 = vld [vmem:[#allocation2 + $0x280] sm:$0xf0]  ;;  %v2765_v19 = vor.u32 %v3085_v60, %v2764_v59  ;;  %v3087_v59 = vld [vmem:[#allocation2 + $0x1cc] sm:$0xf] }
 0x188   : > { %v2869_v17 = vor.u32 %v3110_v2, %v2868_v1  ;;  %v2880_v60 = vld [vmem:[#allocation2 + $0x290] sm:$0xf]  ;;  %v2778_v1 = vld [vmem:[#allocation2 + $0x1d4] sm:$0xf0] }
 0x189   : > { %v2784_v2 = vld [vmem:[#allocation2 + $0x1d0] sm:$0xf] }
 0x18b   : > { %v4142_v28 = vpop.f32.mrf.mxu3 }
 0x18d   : > { %v1532_v29 = vpop.f32.mrf.mxu2  ;;  %v1197_v36 = vpop.f32.mrf.mxu0 }
 0x18e   : > { %v4144_v34 = vadd.f32 %v1532_v29, %v1364_v7  ;;  %v1366_v41 = vpop.f32.mrf.mxu1  ;;  %v2766_v7 = vld [vmem:[#allocation2 + $0x1bc] sm:$0xf0] }
 0x18f   : > { %v1367_v42 = vadd.f32 %v1366_v41, %v1197_v36  ;;  %v2769_v29 = vor.u32 %v3084_v62, %v2766_v7  ;;  %v3113_v62 = vld [vmem:[#allocation2 + $0x298] sm:$0xf0] }
 0x190   : > { %5579 = vst [vmem:[#allocation36_spill] sm:$0xff] %v4144_v34  ;;  %1236 = vmatmul.bf16.gmra.mxu0 %v2753_v30  ;;  %1614 = vmatmul.bf16.gmra.mxu3 %v2857_v31  ;;  %v2773_v30 = vor.u32 %v3086_v13, %v2772_v5  ;;  %v3089_v7 = vld [vmem:[#allocation2 + $0x1d8] sm:$0xf0] }
 0x191   : > { %1405 = vmatmul.bf16.gmra.mxu1 %v2757_v37 }
 0x192   : > { %1574 = vmatmul.bf16.gmra.mxu2 %v2761_v40 }
 0x193   : > { %v4146_v44 = vpop.f32.mrf.mxu3 }
 0x195   : > { %v1535_v50 = vpop.f32.mrf.mxu2  ;;  %v1199_v54 = vpop.f32.mrf.mxu0 }
 0x196   : > { %v4148_v52 = vadd.f32 %v1535_v50, %v1367_v42  ;;  %v1368_v56 = vpop.f32.mrf.mxu1 }
 0x197   : > { %v1369_v58 = vadd.f32 %v1368_v56, %v1199_v54  ;;  %v2776_v56 = vld [vmem:[#allocation2 + $0x1c8] sm:$0xf] }
 0x198   : > { %5580 = vst [vmem:[#allocation37_spill] sm:$0xff] %v4148_v52 }
 0x19b   : > { %v4150_v15 = vpop.f32.mrf.mxu3 }
 0x19d   : > { %v1537_v18 = vpop.f32.mrf.mxu2  ;;  %v1202_v27 = vpop.f32.mrf.mxu0 }
 0x19e   : > { %v4152_v24 = vadd.f32 %v1537_v18, %v1369_v58  ;;  %v1371_v31 = vpop.f32.mrf.mxu1  ;;  %v3088_v58 = vld [vmem:[#allocation2 + $0x1d0] sm:$0xf0] }
 0x19f   : > { %v1372_v36 = vadd.f32 %v1371_v31, %v1202_v27  ;;  %v2777_v18 = vor.u32 %v3088_v58, %v2776_v56  ;;  %v2788_v58 = vld [vmem:[#allocation2 + $0x1e0] sm:$0xf] }
 0x1a0   : > { %5581 = vst [vmem:[#allocation38_spill] sm:$0xff] %v4152_v24  ;;  %1241 = vmatmul.bf16.gmra.mxu0 %v2765_v19  ;;  %1619 = vmatmul.bf16.gmra.mxu3 %v2869_v17  ;;  %v2881_v19 = vor.u32 %v3113_v62, %v2880_v60  ;;  %v3090_v60 = vld [vmem:[#allocation2 + $0x1e4] sm:$0xf]  ;;  %v2892_v62 = vld [vmem:[#allocation2 + $0x2a8] sm:$0xf] }
 0x1a1   : > { %1410 = vmatmul.bf16.gmra.mxu1 %v2769_v29  ;;  %v2781_v29 = vor.u32 %v3087_v59, %v2778_v1  ;;  %v3116_v59 = vld [vmem:[#allocation2 + $0x2b0] sm:$0xf0]  ;;  %v2790_v1 = vld [vmem:[#allocation2 + $0x1ec] sm:$0xf0] }
 0x1a2   : > { %1579 = vmatmul.bf16.gmra.mxu2 %v2773_v30  ;;  %v2785_v30 = vor.u32 %v3089_v7, %v2784_v2  ;;  %v2796_v2 = vld [vmem:[#allocation2 + $0x1e8] sm:$0xf]  ;;  %v3092_v7 = vld [vmem:[#allocation2 + $0x1f0] sm:$0xf0] }
 0x1a3   : > { %v4154_v37 = vpop.f32.mrf.mxu3 }
 0x1a5   : > { %v1540_v40 = vpop.f32.mrf.mxu2  ;;  %v1204_v42 = vpop.f32.mrf.mxu0 }
 0x1a6   : > { %v4156_v41 = vadd.f32 %v1540_v40, %v1372_v36  ;;  %v1373_v50 = vpop.f32.mrf.mxu1 }
 0x1a7   : > { %v1374_v54 = vadd.f32 %v1373_v50, %v1204_v42 }
 0x1a8   : > { %5582 = vst [vmem:[#allocation39_spill] sm:$0xff] %v4156_v41 }
 0x1ab   : > { %v4158_v5 = vpop.f32.mrf.mxu3 }
 0x1ad   : > { %v1542_v13 = vpop.f32.mrf.mxu2  ;;  %v1207_v27 = vpop.f32.mrf.mxu0 }
 0x1ae   : > { %v4160_v17 = vadd.f32 %v1542_v13, %v1374_v54  ;;  %v1376_v31 = vpop.f32.mrf.mxu1  ;;  %v3091_v54 = vld [vmem:[#allocation2 + $0x1e8] sm:$0xf0] }
 0x1af   : > { %v1377_v36 = vadd.f32 %v1376_v31, %v1207_v27  ;;  %v2893_v27 = vor.u32 %v3116_v59, %v2892_v62  ;;  %v2793_v31 = vor.u32 %v3090_v60, %v2790_v1  ;;  %v3093_v62 = vld [vmem:[#allocation2 + $0x1fc] sm:$0xf]  ;;  %v2904_v59 = vld [vmem:[#allocation2 + $0x2c0] sm:$0xf]  ;;  %v3119_v60 = vld [vmem:[#allocation2 + $0x2c8] sm:$0xf0] }
 0x1b0   : > { %5583 = vst [vmem:[#allocation40_spill] sm:$0xff] %v4160_v17  ;;  %1246 = vmatmul.bf16.gmra.mxu0 %v2777_v18  ;;  %1624 = vmatmul.bf16.gmra.mxu3 %v2881_v19  ;;  %v2789_v19 = vor.u32 %v3091_v54, %v2788_v58  ;;  %v2800_v54 = vld [vmem:[#allocation2 + $0x1f8] sm:$0xf]  ;;  %v2802_v1 = vld [vmem:[#allocation2 + $0x204] sm:$0xf0] }
 0x1b1   : > { %1415 = vmatmul.bf16.gmra.mxu1 %v2781_v29 }
 0x1b2   : > { %1584 = vmatmul.bf16.gmra.mxu2 %v2785_v30 }
 0x1b3   : > { %v4162_v40 = vpop.f32.mrf.mxu3 }
 0x1b4   : > { %5584 = vst [vmem:[#allocation41_spill] sm:$0xff] %v4162_v40 }
 0x1b5   : > { %v1545_v42 = vpop.f32.mrf.mxu2  ;;  %v1209_v43 = vpop.f32.mrf.mxu0 }
 0x1b6   : > { %v4164_v50 = vadd.f32 %v1545_v42, %v1377_v36  ;;  %v1378_v22 = vpop.f32.mrf.mxu1  ;;  %v2797_v36 = vor.u32 %v3092_v7, %v2796_v2  ;;  %v2808_v2 = vld [vmem:[#allocation2 + $0x200] sm:$0xf]  ;;  %v3095_v7 = vld [vmem:[#allocation2 + $0x208] sm:$0xf0] }
 0x1b7   : > { %v1379_v56 = vadd.f32 %v1378_v22, %v1209_v43 }
 0x1b8   : > { %5585 = vst [vmem:[#allocation42_spill] sm:$0xff] %v4164_v50 }
 0x1bb   : > { %v4166_v13 = vpop.f32.mrf.mxu3 }
 0x1bc   : > { %5586 = vst [vmem:[#allocation43_spill] sm:$0xff] %v4166_v13 }
 0x1bd   : > { %v1547_v18 = vpop.f32.mrf.mxu2  ;;  %v1212_v30 = vpop.f32.mrf.mxu0 }
 0x1be   : > { %v4168_v29 = vadd.f32 %v1547_v18, %v1379_v56  ;;  %v1381_v42 = vpop.f32.mrf.mxu1  ;;  %v3094_v56 = vld [vmem:[#allocation2 + $0x200] sm:$0xf0] }
 0x1bf   : > { %v1382_v22 = vadd.f32 %v1381_v42, %v1212_v30  ;;  %v2905_v30 = vor.u32 %v3119_v60, %v2904_v59  ;;  %v2809_v42 = vor.u32 %v3095_v7, %v2808_v2  ;;  %v3096_v59 = vld [vmem:[#allocation2 + $0x214] sm:$0xf]  ;;  %v2916_v60 = vld [vmem:[#allocation2 + $0x2d8] sm:$0xf]  ;;  %v3098_v7 = vld [vmem:[#allocation2 + $0x220] sm:$0xf0] }
 0x1c0   : > { %5587 = vst [vmem:[#allocation44_spill] sm:$0xff] %v4168_v29  ;;  %1251 = vmatmul.bf16.gmra.mxu0 %v2789_v19  ;;  %1629 = vmatmul.bf16.gmra.mxu3 %v2893_v27  ;;  %v2801_v27 = vor.u32 %v3094_v56, %v2800_v54  ;;  %v2812_v56 = vld [vmem:[#allocation2 + $0x210] sm:$0xf]  ;;  %v2820_v2 = vld [vmem:[#allocation2 + $0x218] sm:$0xf] }
 0x1c1   : > { %1420 = vmatmul.bf16.gmra.mxu1 %v2793_v31 }
 0x1c2   : > { %1589 = vmatmul.bf16.gmra.mxu2 %v2797_v36  ;;  %v2805_v36 = vor.u32 %v3093_v62, %v2802_v1  ;;  %v3122_v62 = vld [vmem:[#allocation2 + $0x2e0] sm:$0xf0]  ;;  %v2814_v1 = vld [vmem:[#allocation2 + $0x21c] sm:$0xf0] }
 0x1c3   : > { %v4170_v43 = vpop.f32.mrf.mxu3 }
 0x1c4   : > { %5588 = vst [vmem:[#allocation45_spill] sm:$0xff] %v4170_v43 }
 0x1c5   : > { %v1550_v3 = vpop.f32.mrf.mxu2  ;;  %v1214_v32 = vpop.f32.mrf.mxu0 }
 0x1c6   : > { %v4172_v47 = vadd.f32 %v1550_v3, %v1382_v22  ;;  %v1383_v11 = vpop.f32.mrf.mxu1 }
 0x1c7   : > { %v1384_v58 = vadd.f32 %v1383_v11, %v1214_v32 }
 0x1c8   : > { %5589 = vst [vmem:[#allocation46_spill] sm:$0xff] %v4172_v47 }
 0x1cb   : > { %v4174_v18 = vpop.f32.mrf.mxu3 }
 0x1cc   : > { %5590 = vst [vmem:[#allocation47_spill] sm:$0xff] %v4174_v18 }
 0x1cd   : > { %v1552_v19 = vpop.f32.mrf.mxu2  ;;  %v1217_v3 = vpop.f32.mrf.mxu0 }
 0x1ce   : > { %v4176_v31 = vadd.f32 %v1552_v19, %v1384_v58  ;;  %v1386_v22 = vpop.f32.mrf.mxu1  ;;  %v3097_v58 = vld [vmem:[#allocation2 + $0x218] sm:$0xf0] }
 0x1cf   : > { %v1387_v11 = vadd.f32 %v1386_v22, %v1217_v3  ;;  %v2917_v3 = vor.u32 %v3122_v62, %v2916_v60  ;;  %v2821_v22 = vor.u32 %v3098_v7, %v2820_v2  ;;  %v3099_v60 = vld [vmem:[#allocation2 + $0x22c] sm:$0xf]  ;;  %v2928_v62 = vld [vmem:[#allocation2 + $0x2f0] sm:$0xf]  ;;  %v3101_v7 = vld [vmem:[#allocation2 + $0x238] sm:$0xf0] }
 0x1d0   : > { %5591 = vst [vmem:[#allocation48_spill] sm:$0xff] %v4176_v31  ;;  %1256 = vmatmul.bf16.gmra.mxu0 %v2801_v27  ;;  %1634 = vmatmul.bf16.gmra.mxu3 %v2905_v30  ;;  %v2813_v30 = vor.u32 %v3097_v58, %v2812_v56  ;;  %v2824_v58 = vld [vmem:[#allocation2 + $0x228] sm:$0xf]  ;;  %v2832_v2 = vld [vmem:[#allocation2 + $0x230] sm:$0xf] }
 0x1d1   : > { %1425 = vmatmul.bf16.gmra.mxu1 %v2805_v36 }
 0x1d2   : > { %1594 = vmatmul.bf16.gmra.mxu2 %v2809_v42  ;;  %v2817_v42 = vor.u32 %v3096_v59, %v2814_v1  ;;  %v3125_v59 = vld [vmem:[#allocation2 + $0x2f8] sm:$0xf0]  ;;  %v2826_v1 = vld [vmem:[#allocation2 + $0x234] sm:$0xf0] }
 0x1d3   : > { %v4178_v32 = vpop.f32.mrf.mxu3 }
 0x1d4   : > { %5592 = vst [vmem:[#allocation49_spill] sm:$0xff] %v4178_v32 }
 0x1d5   : > { %v1555_v63 = vpop.f32.mrf.mxu2  ;;  %v1219_v18 = vpop.f32.mrf.mxu0 }
 0x1d6   : > { %v4180_v43 = vadd.f32 %v1555_v63, %v1387_v11  ;;  %v1388_v46 = vpop.f32.mrf.mxu1 }
 0x1d7   : > { %v1389_v54 = vadd.f32 %v1388_v46, %v1219_v18 }
 0x1d8   : > { %5593 = vst [vmem:[#allocation50_spill] sm:$0xff] %v4180_v43 }
 0x1db   : > { %v4182_v19 = vpop.f32.mrf.mxu3 }
 0x1dc   : > { %5594 = vst [vmem:[#allocation51_spill] sm:$0xff] %v4182_v19 }
 0x1dd   : > { %v1557_v27 = vpop.f32.mrf.mxu2  ;;  %v1222_v63 = vpop.f32.mrf.mxu0 }
 0x1de   : > { %v4184_v36 = vadd.f32 %v1557_v27, %v1389_v54  ;;  %v1391_v11 = vpop.f32.mrf.mxu1  ;;  %v3100_v54 = vld [vmem:[#allocation2 + $0x230] sm:$0xf0] }
 0x1df   : > { %v1392_v46 = vadd.f32 %v1391_v11, %v1222_v63  ;;  %v2929_v63 = vor.u32 %v3125_v59, %v2928_v62  ;;  %v2833_v11 = vor.u32 %v3101_v7, %v2832_v2  ;;  %v1442_v2 = vadd.f32 %v4138_v61, %v4074_v9 }
 0x1e0   : > { %5595 = vst [vmem:[#allocation52_spill] sm:$0xff] %v4184_v36  ;;  %1261 = vmatmul.bf16.gmra.mxu0 %v2813_v30  ;;  %1639 = vmatmul.bf16.gmra.mxu3 %v2917_v3  ;;  %v2825_v3 = vor.u32 %v3100_v54, %v2824_v58 }
 0x1e1   : > { %1430 = vmatmul.bf16.gmra.mxu1 %v2817_v42 }
 0x1e2   : > { %1599 = vmatmul.bf16.gmra.mxu2 %v2821_v22  ;;  %v2829_v22 = vor.u32 %v3099_v60, %v2826_v1 }
 0x1e3   : > { %v4186_v18 = vpop.f32.mrf.mxu3 }
 0x1e4   : > { %5596 = vst [vmem:[#allocation53_spill] sm:$0xff] %v4186_v18 }
 0x1e5   : > { %v1560_v32 = vpop.f32.mrf.mxu2  ;;  %v1224_v19 = vpop.f32.mrf.mxu0 }
 0x1e6   : > { %v4188_v13 = vadd.f32 %v1560_v32, %v1392_v46  ;;  %v1393_v35 = vpop.f32.mrf.mxu1 }
 0x1e7   : > { %v1394_v56 = vadd.f32 %v1393_v35, %v1224_v19 }
 0x1e8   : > { %5597 = vst [vmem:[#allocation54_spill] sm:$0xff] %v4188_v13 }
 0x1eb   : > { %v4190_v27 = vpop.f32.mrf.mxu3 }
 0x1ec   : > { %5598 = vst [vmem:[#allocation55_spill] sm:$0xff] %v4190_v27 }
 0x1ed   : > { %v1562_v30 = vpop.f32.mrf.mxu2  ;;  %v1227_v32 = vpop.f32.mrf.mxu0 }
 0x1ee   : > { %v4192_v42 = vadd.f32 %v1562_v30, %v1394_v56  ;;  %v1396_v46 = vpop.f32.mrf.mxu1 }
 0x1ef   : > { %v1397_v35 = vadd.f32 %v1396_v46, %v1227_v32 }
 0x1f0   : > { %5599 = vst [vmem:[#allocation56_spill] sm:$0xff] %v4192_v42  ;;  %1266 = vmatmul.bf16.gmra.mxu0 %v2825_v3  ;;  %1644 = vmatmul.bf16.gmra.mxu3 %v2929_v63 }
 0x1f1   : > { %1435 = vmatmul.bf16.gmra.mxu1 %v2829_v22 }
 0x1f2   : > { %1604 = vmatmul.bf16.gmra.mxu2 %v2833_v11 }
 0x1f3   : > { %v4194_v19 = vpop.f32.mrf.mxu3 }
 0x1f5   : > { %v1565_v18 = vpop.f32.mrf.mxu2  ;;  %v1229_v27 = vpop.f32.mrf.mxu0 }
 0x1f6   : > { %v4196_v40 = vadd.f32 %v1565_v18, %v1397_v35  ;;  %v1398_v14 = vpop.f32.mrf.mxu1 }
 0x1f7   : > { %v1399_v58 = vadd.f32 %v1398_v14, %v1229_v27  ;;  %v1444_v27 = vadd.f32 %v4142_v28, %v4078_v20 }
 0x1f8   : > { %5600 = vst [vmem:[#allocation57_spill] sm:$0xff] %v4196_v40 }
 0x1fb   : > { %v4198_v54 = vpop.f32.mrf.mxu3 }
 0x1fd   : > { %v1567_v56 = vpop.f32.mrf.mxu2  ;;  %v1232_v60 = vpop.f32.mrf.mxu0 }
 0x1fe   : > { %v4200_v62 = vadd.f32 %v1567_v56, %v1399_v58  ;;  %v1401_v59 = vpop.f32.mrf.mxu1  ;;  %v1447_v56 = vadd.f32 %v4146_v44, %v4082_v23  ;;  %v1722_v44 = vmul.f32 %v4080_v26, %v4080_v26 }
 0x1ff   : > { %v1402_v1 = vadd.f32 %v1401_v59, %v1232_v60 }
 0x203   : > { %v1610_v7 = vpop.f32.mrf.mxu3 }
 0x204   : > { %v4204_v3 = vadd.f32 %v1610_v7, %v1442_v2 }
 0x205   : > { %v1570_v30 = vpop.f32.mrf.mxu2  ;;  %v1234_v63 = vpop.f32.mrf.mxu0 }
 0x206   : > { %v4206_v18 = vadd.f32 %v1570_v30, %v1402_v1  ;;  %v1403_v32 = vpop.f32.mrf.mxu1  ;;  %v1449_v30 = vadd.f32 %v4150_v15, %v4086_v45  ;;  %v1723_v45 = vmul.f32 %v4084_v33, %v4084_v33  ;;  %v1452_v15 = vadd.f32 %v4154_v37, %v4090_v55 }
 0x207   : > { %v1404_v14 = vadd.f32 %v1403_v32, %v1234_v63 }
 0x20b   : > { %v1612_v22 = vpop.f32.mrf.mxu3 }
 0x20c   : > { %v4210_v46 = vadd.f32 %v1612_v22, %v1444_v27 }
 0x20d   : > { %v1572_v11 = vpop.f32.mrf.mxu2  ;;  %v1237_v58 = vpop.f32.mrf.mxu0 }
 0x20e   : > { %v4212_v35 = vadd.f32 %v1572_v11, %v1404_v14  ;;  %v1406_v9 = vpop.f32.mrf.mxu1 }
 0x20f   : > { %v1407_v61 = vadd.f32 %v1406_v9, %v1237_v58  ;;  %v1721_v58 = vmul.f32 %v4076_v8, %v4076_v8  ;;  %v1651_v9 = vadd.f32 %v4080_v26, %v4076_v8 }
 0x210   : > { %5601 = vst [vmem:[#allocation58_spill] sm:$0xff] %v4212_v35 }
 0x213   : > { %v1615_v60 = vpop.f32.mrf.mxu3 }
 0x214   : > { %v4216_v1 = vadd.f32 %v1615_v60, %v1447_v56  ;;  %v1652_v56 = vadd.f32 %v1651_v9, %v4084_v33  ;;  %v1724_v60 = vmul.f32 %v4088_v49, %v4088_v49 }
 0x215   : > { %v1575_v59 = vpop.f32.mrf.mxu2  ;;  %v1239_v7 = vpop.f32.mrf.mxu0 }
 0x216   : > { %v4218_v2 = vadd.f32 %v1575_v59, %v1407_v61  ;;  %v1408_v20 = vpop.f32.mrf.mxu1  ;;  %v1785_v61 = vadd.f32 %v1722_v44, %v1721_v58  ;;  %v1726_v44 = vmul.f32 %v4096_v12, %v4096_v12 }
 0x217   : > { %v1409_v28 = vadd.f32 %v1408_v20, %v1239_v7 }
 0x21b   : > { %v1617_v63 = vpop.f32.mrf.mxu3 }
 0x21c   : > { %v4222_v14 = vadd.f32 %v1617_v63, %v1449_v30  ;;  %v1653_v30 = vadd.f32 %v1652_v56, %v4088_v49  ;;  %v1725_v63 = vmul.f32 %v4092_v57, %v4092_v57 }
 0x21d   : > { %v1577_v32 = vpop.f32.mrf.mxu2  ;;  %v1242_v22 = vpop.f32.mrf.mxu0 }
 0x21e   : > { %v4224_v27 = vadd.f32 %v1577_v32, %v1409_v28  ;;  %v1411_v23 = vpop.f32.mrf.mxu1  ;;  %v1786_v28 = vadd.f32 %v1785_v61, %v1723_v45  ;;  %v1727_v45 = vmul.f32 %v4100_v21, %v4100_v21  ;;  %v1728_v61 = vmul.f32 %v4104_v39, %v4104_v39 }
 0x21f   : > { %v1412_v11 = vadd.f32 %v1411_v23, %v1242_v22  ;;  %v1654_v23 = vadd.f32 %v1653_v30, %v4092_v57 }
 0x220   : > { %v1787_v37 = vadd.f32 %v1786_v28, %v1724_v60 }
 0x221   : > { %v1655_v9 = vadd.f32 %v1654_v23, %v4096_v12  ;;  %v1730_v23 = vmul.f32 %v4112_v4, %v4112_v4 }
 0x222   : > { %v1788_v58 = vadd.f32 %v1787_v37, %v1725_v63 }
 0x223   : > { %v1620_v59 = vpop.f32.mrf.mxu3 }
 0x224   : > { %v4239_v20 = vadd.f32 %v1620_v59, %v1452_v15  ;;  %v1789_v15 = vadd.f32 %v1788_v58, %v1726_v44 }
 0x225   : > { %v1580_v7 = vpop.f32.mrf.mxu2  ;;  %v4246_v22 = vpop.f32.mrf.mxu0 }
 0x226   : > { %v4244_v32 = vadd.f32 %v1580_v7, %v1412_v11  ;;  %v4248_v55 = vpop.f32.mrf.mxu1  ;;  %v1656_v11 = vadd.f32 %v1655_v9, %v4100_v21  ;;  %v1790_v60 = vadd.f32 %v1789_v15, %v1727_v45  ;;  %v1729_v7 = vmul.f32 %v4108_v48, %v4108_v48 }
 0x227   : > { %v1731_v9 = vmul.f32 %v4116_v16, %v4116_v16 }
 0x228   : > { %v1657_v59 = vadd.f32 %v1656_v11, %v4104_v39  ;;  %v1791_v63 = vadd.f32 %v1790_v60, %v1728_v61  ;;  %v1732_v11 = vmul.f32 %v4120_v38, %v4120_v38 }
 0x22a   : > { %v1658_v37 = vadd.f32 %v1657_v59, %v4108_v48  ;;  %v1792_v44 = vadd.f32 %v1791_v63, %v1729_v7  ;;  %v1733_v7 = vmul.f32 %v4124_v51, %v4124_v51 }
 0x22b   : > { %v4277_v39 = vpop.f32.mrf.mxu3 }
 0x22c   : > { %v1659_v58 = vadd.f32 %v1658_v37, %v4112_v4  ;;  %v1793_v45 = vadd.f32 %v1792_v44, %v1730_v23 }
 0x22d   : > { %v4259_v56 = vpop.f32.mrf.mxu2  ;;  %v4264_v28 = vpop.f32.mrf.mxu0 }
 0x22e   : > { %v4266_v30 = vpop.f32.mrf.mxu1  ;;  %v1660_v15 = vadd.f32 %v1659_v58, %v4116_v16  ;;  %v1794_v60 = vadd.f32 %v1793_v45, %v1731_v9  ;;  %v1734_v58 = vmul.f32 %v4128_v10, %v4128_v10  ;;  %v1735_v9 = vmul.f32 %v4132_v25, %v4132_v25 }
 0x230   : > { %v1661_v59 = vadd.f32 %v1660_v15, %v4120_v38  ;;  %v1795_v23 = vadd.f32 %v1794_v60, %v1732_v11  ;;  %v1736_v38 = vmul.f32 %v4136_v53, %v4136_v53 }
 0x232   : > { %v1662_v44 = vadd.f32 %v1661_v59, %v4124_v51  ;;  %v1796_v16 = vadd.f32 %v1795_v23, %v1733_v7  ;;  %v1737_v59 = vmul.f32 %v4140_v0, %v4140_v0 }
 0x233   : > { %v4304_v23 = vpop.f32.mrf.mxu3 }
 0x234   : > { %v1663_v4 = vadd.f32 %v1662_v44, %v4128_v10  ;;  %v1797_v45 = vadd.f32 %v1796_v16, %v1734_v58  ;;  %v1738_v58 = vmul.f32 %v4144_v34, %v4144_v34  ;;  %v1740_v10 = vmul.f32 %v4152_v24, %v4152_v24 }
 0x235   : > { %v4279_v61 = vpop.f32.mrf.mxu2  ;;  %v4284_v63 = vpop.f32.mrf.mxu0 }
 0x236   : > { %v4286_v37 = vpop.f32.mrf.mxu1  ;;  %v1664_v15 = vadd.f32 %v1663_v4, %v4132_v25  ;;  %v1798_v11 = vadd.f32 %v1797_v45, %v1735_v9  ;;  %v1739_v45 = vmul.f32 %v4148_v52, %v4148_v52 }
 0x238   : > { %v1665_v60 = vadd.f32 %v1664_v15, %v4136_v53  ;;  %v1799_v16 = vadd.f32 %v1798_v11, %v1736_v38 }
 0x23a   : > { %v1666_v4 = vadd.f32 %v1665_v60, %v4140_v0  ;;  %v1800_v25 = vadd.f32 %v1799_v16, %v1737_v59  ;;  %v1741_v60 = vmul.f32 %v4156_v41, %v4156_v41 }
 0x23c   : > { %v1667_v9 = vadd.f32 %v1666_v4, %v4144_v34  ;;  %v1801_v15 = vadd.f32 %v1800_v25, %v1738_v58  ;;  %v1742_v58 = vmul.f32 %v4160_v17, %v4160_v17  ;;  %v1744_v34 = vmul.f32 %v4168_v29, %v4168_v29 }
 0x23d   : > { %v4297_v48 = vpop.f32.mrf.mxu2  ;;  %v4302_v7 = vpop.f32.mrf.mxu0 }
 0x23e   : > { %v4306_v44 = vpop.f32.mrf.mxu1  ;;  %v1668_v53 = vadd.f32 %v1667_v9, %v4148_v52  ;;  %v1802_v38 = vadd.f32 %v1801_v15, %v1739_v45  ;;  %v4329_v9 = vpop.f32.mrf.mxu3 }
 0x240   : > { %v1669_v11 = vadd.f32 %v1668_v53, %v4152_v24  ;;  %v1803_v4 = vadd.f32 %v1802_v38, %v1740_v10  ;;  %v1743_v53 = vmul.f32 %v4164_v50, %v4164_v50 }
 0x242   : > { %v1670_v25 = vadd.f32 %v1669_v11, %v4156_v41  ;;  %v1804_v52 = vadd.f32 %v1803_v4, %v1741_v60  ;;  %v1745_v41 = vmul.f32 %v4172_v47, %v4172_v47 }
 0x244   : > { %v1671_v45 = vadd.f32 %v1670_v25, %v4160_v17  ;;  %v1805_v15 = vadd.f32 %v1804_v52, %v1742_v58  ;;  %v1746_v58 = vmul.f32 %v4176_v31, %v4176_v31  ;;  %v1748_v17 = vmul.f32 %v4184_v36, %v4184_v36 }
 0x245   : > { %v4317_v51 = vpop.f32.mrf.mxu2  ;;  %v4322_v59 = vpop.f32.mrf.mxu0 }
 0x246   : > { %v4324_v16 = vpop.f32.mrf.mxu1  ;;  %v1672_v24 = vadd.f32 %v1671_v45, %v4164_v50  ;;  %v1806_v38 = vadd.f32 %v1805_v15, %v1743_v53  ;;  %v1747_v53 = vmul.f32 %v4180_v43, %v4180_v43 }
 0x248   : > { %v1673_v11 = vadd.f32 %v1672_v24, %v4168_v29  ;;  %v1807_v25 = vadd.f32 %v1806_v38, %v1744_v34  ;;  %v4352_v24 = vpop.f32.mrf.mxu3 }
 0x24a   : > { %v1674_v52 = vadd.f32 %v1673_v11, %v4172_v47  ;;  %v1808_v45 = vadd.f32 %v1807_v25, %v1745_v41  ;;  %v1749_v41 = vmul.f32 %v4188_v13, %v4188_v13 }
 0x24c   : > { %v1675_v50 = vadd.f32 %v1674_v52, %v4176_v31  ;;  %v1809_v15 = vadd.f32 %v1808_v45, %v1746_v58  ;;  %v1750_v58 = vmul.f32 %v4192_v42, %v4192_v42 }
 0x24d   : > { %v4337_v10 = vpop.f32.mrf.mxu2  ;;  %v4342_v60 = vpop.f32.mrf.mxu0 }
 0x24e   : > { %v4344_v4 = vpop.f32.mrf.mxu1  ;;  %v1676_v29 = vadd.f32 %v1675_v50, %v4180_v43  ;;  %v1810_v38 = vadd.f32 %v1809_v15, %v1747_v53  ;;  %v1751_v43 = vmul.f32 %v4196_v40, %v4196_v40  ;;  %v1752_v15 = vmul.f32 %v4200_v62, %v4200_v62 }
 0x250   : > { %v1677_v11 = vadd.f32 %v1676_v29, %v4184_v36  ;;  %v1811_v31 = vadd.f32 %v1810_v38, %v1748_v17  ;;  %v4371_v36 = vpop.f32.mrf.mxu3 }
 0x252   : > { %v1678_v47 = vadd.f32 %v1677_v11, %v4188_v13  ;;  %v1812_v50 = vadd.f32 %v1811_v31, %v1749_v41  ;;  %v1753_v31 = vmul.f32 %v4206_v18, %v4206_v18 }
 0x254   : > { %v1679_v45 = vadd.f32 %v1678_v47, %v4192_v42  ;;  %v1813_v53 = vadd.f32 %v1812_v50, %v1750_v58  ;;  %v1754_v58 = vmul.f32 %v4212_v35, %v4212_v35 }
 0x255   : > { %v4357_v34 = vpop.f32.mrf.mxu2  ;;  %v1259_v25 = vpop.f32.mrf.mxu0 }
 0x256   : > { %v1428_v52 = vpop.f32.mrf.mxu1  ;;  %v1680_v29 = vadd.f32 %v1679_v45, %v4196_v40  ;;  %v1814_v38 = vadd.f32 %v1813_v53, %v1751_v43  ;;  %v1755_v40 = vmul.f32 %v4218_v2, %v4218_v2  ;;  %v1414_v43 = vadd.f32 %v4248_v55, %v4246_v22 }
 0x257   : > { %v1417_v53 = vadd.f32 %v4266_v30, %v4264_v28  ;;  %v1757_v22 = vmul.f32 %v4244_v32, %v4244_v32  ;;  %v1419_v28 = vadd.f32 %v4286_v37, %v4284_v63  ;;  %v1422_v30 = vadd.f32 %v4306_v44, %v4302_v7 }
 0x258   : > { %v1681_v11 = vadd.f32 %v1680_v29, %v4200_v62  ;;  %v1815_v42 = vadd.f32 %v1814_v38, %v1752_v15  ;;  %v1756_v38 = vmul.f32 %v4224_v27, %v4224_v27  ;;  %v1424_v7 = vadd.f32 %v4324_v16, %v4322_v59 }
 0x259   : > { %v4396_v55 = vadd.f32 %v4279_v61, %v1417_v53  ;;  %v4414_v37 = vadd.f32 %v4317_v51, %v1422_v30  ;;  %v1427_v44 = vadd.f32 %v4344_v4, %v4342_v60  ;;  %v1429_v4 = vadd.f32 %v1428_v52, %v1259_v25 }
 0x25a   : > { %v1682_v13 = vadd.f32 %v1681_v11, %v4206_v18  ;;  %v1816_v50 = vadd.f32 %v1815_v42, %v1753_v31  ;;  %v4390_v11 = vadd.f32 %v4259_v56, %v1414_v43  ;;  %v4408_v43 = vadd.f32 %v4297_v48, %v1419_v28 }
 0x25b   : > { %v1759_v63 = vmul.f32 %v4396_v55, %v4396_v55  ;;  %v4430_v60 = vadd.f32 %v4357_v34, %v1427_v44 }
 0x25c   : > { %v1683_v45 = vadd.f32 %v1682_v13, %v4212_v35  ;;  %v1817_v29 = vadd.f32 %v1816_v50, %v1754_v58  ;;  %v4402_v58 = vpop.f32.mrf.mxu3  ;;  %v1760_v48 = vmul.f32 %v4408_v43, %v4408_v43 }
 0x25d   : > { %v1597_v17 = vpop.f32.mrf.mxu2  ;;  %v1262_v41 = vpop.f32.mrf.mxu0 }
 0x25e   : > { %v1431_v47 = vpop.f32.mrf.mxu1  ;;  %v1684_v15 = vadd.f32 %v1683_v45, %v4218_v2  ;;  %v1818_v13 = vadd.f32 %v1817_v29, %v1755_v40  ;;  %v1758_v45 = vmul.f32 %v4390_v11, %v4390_v11 }
 0x25f   : > { %v1432_v28 = vadd.f32 %v1431_v47, %v1262_v41 }
 0x260   : > { %v1685_v31 = vadd.f32 %v1684_v15, %v4224_v27  ;;  %v1819_v50 = vadd.f32 %v1818_v13, %v1756_v38  ;;  %v4424_v13 = vadd.f32 %v4337_v10, %v1424_v7 }
 0x262   : > { %v1686_v40 = vadd.f32 %v1685_v31, %v4244_v32  ;;  %v1820_v61 = vadd.f32 %v1819_v50, %v1757_v22  ;;  %v1761_v22 = vmul.f32 %v4414_v37, %v4414_v37  ;;  %v1762_v10 = vmul.f32 %v4424_v13, %v4424_v13 }
 0x264   : > { %v1687_v53 = vadd.f32 %v1686_v40, %v4390_v11  ;;  %v1821_v29 = vadd.f32 %v1820_v61, %v1758_v45  ;;  %v4433_v40 = vpop.f32.mrf.mxu3  ;;  %v4437_v45 = vadd.f32 %v1597_v17, %v1429_v4 }
 0x265   : > { %v1600_v42 = vpop.f32.mrf.mxu2  ;;  %v1264_v35 = vpop.f32.mrf.mxu0 }
 0x266   : > { %v1433_v56 = vpop.f32.mrf.mxu1  ;;  %v1688_v15 = vadd.f32 %v1687_v53, %v4396_v55  ;;  %v1822_v31 = vadd.f32 %v1821_v29, %v1759_v63  ;;  %v1763_v63 = vmul.f32 %v4430_v60, %v4430_v60  ;;  %v4442_v34 = vadd.f32 %v1600_v42, %v1432_v28 }
 0x267   : > { %v1434_v25 = vadd.f32 %v1433_v56, %v1264_v35  ;;  %v1764_v44 = vmul.f32 %v4437_v45, %v4437_v45 }
 0x268   : > { %v1689_v51 = vadd.f32 %v1688_v15, %v4408_v43  ;;  %v1823_v30 = vadd.f32 %v1822_v31, %v1760_v48  ;;  %v1765_v48 = vmul.f32 %v4442_v34, %v4442_v34 }
 0x26a   : > { %v1690_v50 = vadd.f32 %v1689_v51, %v4414_v37  ;;  %v1824_v61 = vadd.f32 %v1823_v30, %v1761_v22 }
 0x26c   : > { %v1691_v53 = vadd.f32 %v1690_v50, %v4424_v13  ;;  %v1825_v47 = vadd.f32 %v1824_v61, %v1762_v10 }
 0x26d   : > { %v1602_v38 = vpop.f32.mrf.mxu2  ;;  %v1267_v59 = vpop.f32.mrf.mxu0 }
 0x26e   : > { %v1436_v16 = vpop.f32.mrf.mxu1  ;;  %v1692_v7 = vadd.f32 %v1691_v53, %v4430_v60  ;;  %v4447_v29 = vadd.f32 %v1602_v38, %v1434_v25  ;;  %v1826_v17 = vadd.f32 %v1825_v47, %v1763_v63 }
 0x26f   : > { %v1437_v52 = vadd.f32 %v1436_v16, %v1267_v59  ;;  %v1640_v59 = vpop.f32.mrf.mxu3 }
 0x270   : > { %v1693_v15 = vadd.f32 %v1692_v7, %v4437_v45  ;;  %v1827_v56 = vadd.f32 %v1826_v17, %v1764_v44  ;;  %v1766_v22 = vmul.f32 %v4447_v29, %v4447_v29  ;;  %v1770_v7 = vmul.f32 %v4210_v46, %v4210_v46 }
 0x272   : > { %v1694_v51 = vadd.f32 %v1693_v15, %v4442_v34  ;;  %v1828_v16 = vadd.f32 %v1827_v56, %v1765_v48  ;;  %v1454_v48 = vadd.f32 %v4158_v5, %v4094_v6  ;;  %v5605_v6 = vld [vmem:[#allocation43_spill] sm:$0xff] }
 0x274   : > { %v1695_v38 = vadd.f32 %v1694_v51, %v4447_v29  ;;  %v1829_v50 = vadd.f32 %v1828_v16, %v1766_v22  ;;  %v5602_v51 = vld [vmem:[#allocation17_spill] sm:$0xff] }
 0x275   : > { %v1605_v41 = vpop.f32.mrf.mxu2  ;;  %v1269_v42 = vpop.f32.mrf.mxu0  ;;  %v5603_v22 = vld [vmem:[#allocation41_spill] sm:$0xff] }
 0x276   : > { %v4452_v31 = vadd.f32 %v1605_v41, %v1437_v52  ;;  %v1438_v35 = vpop.f32.mrf.mxu1  ;;  %v1769_v52 = vmul.f32 %v4204_v3, %v4204_v3  ;;  %v1457_v16 = vadd.f32 %v5603_v22, %v5602_v51 }
 0x277   : > { %v1439_v28 = vadd.f32 %v1438_v35, %v1269_v42  ;;  %v1642_v15 = vpop.f32.mrf.mxu3  ;;  %v1771_v42 = vmul.f32 %v4216_v1, %v4216_v1 }
 0x278   : > { %v1767_v4 = vmul.f32 %v4452_v31, %v4452_v31  ;;  %v1696_v10 = vadd.f32 %v1695_v38, %v4452_v31  ;;  %v1772_v38 = vmul.f32 %v4222_v14, %v4222_v14 }
 0x27a   : > { %v1830_v53 = vadd.f32 %v1829_v50, %v1767_v4  ;;  %v4482_v4 = vadd.f32 %v4277_v39, %v1454_v48  ;;  %v5604_v50 = vld [vmem:[#allocation18_spill] sm:$0xff] }
 0x27b   : > { %v1459_v5 = vadd.f32 %v5605_v6, %v5604_v50  ;;  %v5608_v48 = vld [vmem:[#allocation22_spill] sm:$0xff] }
 0x27c   : > { %v1774_v39 = vmul.f32 %v4482_v4, %v4482_v4 }
 0x27d   : > { %v1607_v30 = vpop.f32.mrf.mxu2 }
 0x27e   : > { %v4461_v61 = vadd.f32 %v1607_v30, %v1439_v28 }
 0x280   : > { %v1697_v63 = vadd.f32 %v1696_v10, %v4461_v61  ;;  %v1768_v25 = vmul.f32 %v4461_v61, %v4461_v61  ;;  %v1773_v10 = vmul.f32 %v4239_v20, %v4239_v20 }
 0x282   : > { %v1698_v41 = vadd.f32 %v1697_v63, %v4204_v3  ;;  %v1831_v47 = vadd.f32 %v1830_v53, %v1768_v25  ;;  %v4490_v53 = vadd.f32 %v4304_v23, %v1457_v16  ;;  %v5610_v16 = vld [vmem:[#allocation24_spill] sm:$0xff] }
 0x284   : > { %v1699_v44 = vadd.f32 %v1698_v41, %v4210_v46  ;;  %v1832_v17 = vadd.f32 %v1831_v47, %v1769_v52  ;;  %v5606_v52 = vld [vmem:[#allocation20_spill] sm:$0xff]  ;;  %v5607_v41 = vld [vmem:[#allocation45_spill] sm:$0xff]  ;;  %v1775_v23 = vmul.f32 %v4490_v53, %v4490_v53 }
 0x285   : > { %v1462_v47 = vadd.f32 %v5607_v41, %v5606_v52 }
 0x286   : > { %v1700_v35 = vadd.f32 %v1699_v44, %v4216_v1  ;;  %v1833_v56 = vadd.f32 %v1832_v17, %v1770_v7  ;;  %v4498_v7 = vadd.f32 %v4329_v9, %v1459_v5  ;;  %v1645_v9 = vpop.f32.mrf.mxu3 }
 0x288   : > { %v1701_v28 = vadd.f32 %v1700_v35, %v4222_v14  ;;  %v1834_v30 = vadd.f32 %v1833_v56, %v1771_v42  ;;  %v5609_v42 = vld [vmem:[#allocation47_spill] sm:$0xff]  ;;  %v4506_v56 = vadd.f32 %v4352_v24, %v1462_v47 }
 0x289   : > { %v1464_v35 = vadd.f32 %v5609_v42, %v5608_v48 }
 0x28a   : > { %v1702_v63 = vadd.f32 %v1701_v28, %v4239_v20  ;;  %v1835_v25 = vadd.f32 %v1834_v30, %v1772_v38  ;;  %v5611_v38 = vld [vmem:[#allocation49_spill] sm:$0xff]  ;;  %v1776_v30 = vmul.f32 %v4498_v7, %v4498_v7 }
 0x28b   : > { %v1467_v28 = vadd.f32 %v5611_v38, %v5610_v16  ;;  %v4514_v50 = vadd.f32 %v4371_v36, %v1464_v35 }
 0x28c   : > { %v1703_v44 = vadd.f32 %v1702_v63, %v4482_v4  ;;  %v1836_v17 = vadd.f32 %v1835_v25, %v1773_v10  ;;  %v5612_v10 = vld [vmem:[#allocation26_spill] sm:$0xff]  ;;  %v5613_v63 = vld [vmem:[#allocation51_spill] sm:$0xff]  ;;  %v1777_v25 = vmul.f32 %v4506_v56, %v4506_v56 }
 0x28d   : > { %v1469_v24 = vadd.f32 %v5613_v63, %v5612_v10  ;;  %v4522_v52 = vadd.f32 %v4402_v58, %v1467_v28  ;;  %v1778_v36 = vmul.f32 %v4514_v50, %v4514_v50 }
 0x28e   : > { %v1704_v51 = vadd.f32 %v1703_v44, %v4490_v53  ;;  %v1837_v22 = vadd.f32 %v1836_v17, %v1774_v39  ;;  %v5614_v39 = vld [vmem:[#allocation28_spill] sm:$0xff]  ;;  %v5615_v44 = vld [vmem:[#allocation53_spill] sm:$0xff] }
 0x28f   : > { %v1472_v17 = vadd.f32 %v5615_v44, %v5614_v39  ;;  %v4530_v48 = vadd.f32 %v4433_v40, %v1469_v24  ;;  %v1779_v58 = vmul.f32 %v4522_v52, %v4522_v52  ;;  %v5619_v24 = vld [vmem:[#allocation34_spill] sm:$0xff] }
 0x290   : > { %v1838_v6 = vadd.f32 %v1837_v22, %v1775_v23  ;;  %v1705_v5 = vadd.f32 %v1704_v51, %v4498_v7  ;;  %v5616_v23 = vld [vmem:[#allocation30_spill] sm:$0xff]  ;;  %v5617_v51 = vld [vmem:[#allocation55_spill] sm:$0xff] }
 0x291   : > { %v1474_v22 = vadd.f32 %v5617_v51, %v5616_v23  ;;  %v4537_v16 = vadd.f32 %v1640_v59, %v1472_v17  ;;  %v1780_v40 = vmul.f32 %v4530_v48, %v4530_v48 }
 0x292   : > { %v1706_v41 = vadd.f32 %v1705_v5, %v4506_v56  ;;  %v1839_v47 = vadd.f32 %v1838_v6, %v1776_v30  ;;  %v5618_v30 = vld [vmem:[#allocation32_spill] sm:$0xff] }
 0x293   : > { %v1477_v6 = vadd.f32 %v4194_v19, %v5618_v30  ;;  %v4544_v5 = vadd.f32 %v1642_v15, %v1474_v22  ;;  %v1781_v59 = vmul.f32 %v4537_v16, %v4537_v16 }
 0x294   : > { %v1707_v42 = vadd.f32 %v1706_v41, %v4514_v50  ;;  %v1840_v35 = vadd.f32 %v1839_v47, %v1777_v25  ;;  %v1479_v25 = vadd.f32 %v4198_v54, %v5619_v24  ;;  %v1647_v41 = vpop.f32.mrf.mxu3 }
 0x295   : > { %v4551_v47 = vadd.f32 %v1645_v9, %v1477_v6  ;;  %v1782_v44 = vmul.f32 %v4544_v5, %v4544_v5 }
 0x296   : > { %v1708_v38 = vadd.f32 %v1707_v42, %v4522_v52  ;;  %v1841_v28 = vadd.f32 %v1840_v35, %v1778_v36  ;;  %v4556_v15 = vadd.f32 %v1647_v41, %v1479_v25 }
 0x297   : > { %v1783_v54 = vmul.f32 %v4551_v47, %v4551_v47 }
 0x298   : > { %v1709_v10 = vadd.f32 %v1708_v38, %v4530_v48  ;;  %v1842_v63 = vadd.f32 %v1841_v28, %v1779_v58  ;;  %v1784_v23 = vmul.f32 %v4556_v15, %v4556_v15 }
 0x29a   : > { %v1710_v39 = vadd.f32 %v1709_v10, %v4537_v16  ;;  %v1843_v19 = vadd.f32 %v1842_v63, %v1780_v40 }
 0x29c   : > { %v1711_v17 = vadd.f32 %v1710_v39, %v4544_v5  ;;  %v1844_v36 = vadd.f32 %v1843_v19, %v1781_v59 }
 0x29e   : > { %v1712_v42 = vadd.f32 %v1711_v17, %v4551_v47  ;;  %v1845_v35 = vadd.f32 %v1844_v36, %v1782_v44 }
 0x2a0   : > { %v1713_v9 = vadd.f32 %v1712_v42, %v4556_v15  ;;  %v1846_v51 = vadd.f32 %v1845_v35, %v1783_v54  ;;  %v4572_v42 = vld [vmem:[%s4004_s7] sm:$0xff]   ;;  %v4575_v35 = vld [vmem:[%s4004_s7 + $0x8] sm:$0xff]  }
 0x2a1   : > { %5620 = vst [vmem:[#allocation17_spill] sm:$0xff] %v4572_v42  ;;  %v5669_v42 = vld [vmem:[#allocation40_spill] sm:$0xff] }
 0x2a2   : > { %v1714_v22 = vrot.slane %v1713_v9, 4  ;;  %v1847_v58 = vadd.f32 %v1846_v51, %v1784_v23  ;;  %5621 = vst [vmem:[#allocation41_spill] sm:$0xff] %v4575_v35  ;;  %v4582_v23 = vld [vmem:[%s4004_s7 + $0x18] sm:$0xff]   ;;  %v4585_v51 = vld [vmem:[%s4004_s7 + $0x20] sm:$0xff]   ;;  %v5667_v35 = vld [vmem:[#allocation39_spill] sm:$0xff] }
 0x2a3   : > { %5623 = vst [vmem:[#allocation43_spill] sm:$0xff] %v4582_v23 }
 0x2a4   : > { %v1715_v38 = vadd.f32 %v1714_v22, %v1713_v9  ;;  %v1848_v28 = vrot.slane %v1847_v58, 4  ;;  %v4579_v9 = vld [vmem:[%s4004_s7 + $0x10] sm:$0xff]   ;;  %5624 = vst [vmem:[#allocation20_spill] sm:$0xff] %v4585_v51  ;;  %v4588_v22 = vld [vmem:[%s4004_s7 + $0x28] sm:$0xff]  }
 0x2a5   : > { %5622 = vst [vmem:[#allocation18_spill] sm:$0xff] %v4579_v9  ;;  %v4670_v51 = vld [vmem:[%s4004_s7 + $0x90] sm:$0xff]   ;;  %v5665_v9 = vld [vmem:[#allocation38_spill] sm:$0xff] }
 0x2a6   : > { %v1716_v30 = vrot.slane %v1715_v38, 2  ;;  %v1849_v6 = vadd.f32 %v1848_v28, %v1847_v58  ;;  %5625 = vst [vmem:[#allocation45_spill] sm:$0xff] %v4588_v22  ;;  %v4635_v58 = vld [vmem:[%s4004_s7 + $0x70] sm:$0xff]   ;;  %v4644_v28 = vld [vmem:[%s4004_s7 + $0x78] sm:$0xff]   ;;  %v4650_v22 = vld [vmem:[%s4004_s7 + $0x80] sm:$0xff]  }
 0x2a7   : > { %5634 = vst [vmem:[#allocation30_spill] sm:$0xff] %v4635_v58  ;;  %v4685_v58 = vld [vmem:[%s4004_s7 + $0xd8] sm:$0xff]  }
 0x2a8   : > { %v1717_v40 = vadd.f32 %v1716_v30, %v1715_v38  ;;  %v1850_v10 = vrot.slane %v1849_v6, 2  ;;  %v4594_v30 = vld [vmem:[%s4004_s7 + $0x30] sm:$0xff]   ;;  %5635 = vst [vmem:[#allocation55_spill] sm:$0xff] %v4644_v28  ;;  %v4682_v28 = vld [vmem:[%s4004_s7 + $0x98] sm:$0xff]   ;;  %v4693_v38 = vld [vmem:[%s4004_s7 + $0xa0] sm:$0xff]  }
 0x2a9   : > { %5626 = vst [vmem:[#allocation22_spill] sm:$0xff] %v4594_v30  ;;  %v4673_v30 = vld [vmem:[%s4004_s7 + $0xd0] sm:$0xff]  }
 0x2aa   : > { %v1718_v63 = vrot.slane %v1717_v40, 1  ;;  %v1851_v24 = vadd.f32 %v1850_v10, %v1849_v6  ;;  %v4597_v6 = vld [vmem:[%s4004_s7 + $0x38] sm:$0xff]   ;;  %5636 = vst [vmem:[#allocation32_spill] sm:$0xff] %v4650_v22  ;;  %v4701_v22 = vld [vmem:[%s4004_s7 + $0xa8] sm:$0xff]  }
 0x2ab   : > { %5627 = vst [vmem:[#allocation47_spill] sm:$0xff] %v4597_v6 }
 0x2ac   : > { %v1719_v25 = vadd.f32 %v1718_v63, %v1717_v40  ;;  %v1852_v41 = vrot.slane %v1851_v24, 1  ;;  %v4623_v40 = vld [vmem:[%s4004_s7 + $0x58] sm:$0xff]   ;;  %5640 = vst [vmem:[#allocation61_spill] sm:$0xff] %v4670_v51 }
 0x2ad   : > { %5631 = vst [vmem:[#allocation51_spill] sm:$0xff] %v4623_v40 }
 0x2ae   : > { %v4565_v59 = vmul.f32 0.001953125, %v1719_v25  ;;  %v1853_v39 = vadd.f32 %v1852_v41, %v1851_v24  ;;  %v4604_v25 = vld [vmem:[%s4004_s7 + $0x40] sm:$0xff]   ;;  %v4632_v24 = vld [vmem:[%s4004_s7 + $0x68] sm:$0xff]   ;;  %5641 = vst [vmem:[#allocation62_spill] sm:$0xff] %v4673_v30  ;;  %v4717_v30 = vld [vmem:[%s4004_s7 + $0xf0] sm:$0xff]  }
 0x2af   : > { %5628 = vst [vmem:[#allocation24_spill] sm:$0xff] %v4604_v25  ;;  %v4664_v25 = vld [vmem:[%s4004_s7 + $0xc8] sm:$0xff]  }
 0x2b0   : > { %v1854_v19 = vmul.f32 0.001953125, %v1853_v39  ;;  %v1855_v44 = vmul.f32 %v4565_v59, %v4565_v59  ;;  %5633 = vst [vmem:[#allocation53_spill] sm:$0xff] %v4632_v24  ;;  %v4653_v39 = vld [vmem:[%s4004_s7 + $0xc0] sm:$0xff]  }
 0x2b1   : > { %5637 = vst [vmem:[#allocation34_spill] sm:$0xff] %v4653_v39  ;;  %v5653_v39 = vld [vmem:[#allocation23_spill] sm:$0xff] }
 0x2b2   : > { %v1856_v17 = vsub.f32 %v1854_v19, %v1855_v44  ;;  %v4626_v19 = vld [vmem:[%s4004_s7 + $0x60] sm:$0xff]   ;;  %5639 = vst [vmem:[#allocation60_spill] sm:$0xff] %v4664_v25  ;;  %v1650_v44 = vld [vmem:[%s3999_s1] sm:$0x3] }
 0x2b3   : > { %5632 = vst [vmem:[#allocation28_spill] sm:$0xff] %v4626_v19  ;;  %v4704_v19 = vld [vmem:[%s4004_s7 + $0xe8] sm:$0xff]  }
 0x2b4   : > { %v1857_v36 = vmax.f32 %v1856_v17, 0.0  ;;  %v4611_v17 = vld [vmem:[%s4004_s7 + $0x48] sm:$0xff]   ;;  %5642 = vst [vmem:[#allocation63_spill] sm:$0xff] %v4682_v28  ;;  %v3468_v28 = vld [vmem:[%s4004_s7 + $0xf8] sm:$0xff]  }
 0x2b5   : > { %5629 = vst [vmem:[#allocation49_spill] sm:$0xff] %v4611_v17  ;;  %v4661_v17 = vld [vmem:[%s4004_s7 + $0x88] sm:$0xff]   ;;  %v3277_v23 = vunpack.c.h.bf16 %v3468_v28 }
 0x2b6   : > { %v4569_v54 = vadd.f32 1e-05, %v1857_v36  ;;  %v4614_v36 = vld [vmem:[%s4004_s7 + $0x50] sm:$0xff]   ;;  %5638 = vst [vmem:[#allocation59_spill] sm:$0xff] %v4661_v17 }
 0x2b7   : > { %5630 = vst [vmem:[#allocation26_spill] sm:$0xff] %v4614_v36 }
 0x2b8   : > { %3601 = vrsqrt.f32 %v4569_v54  ;;  %5643 = vst [vmem:[#allocation64_spill] sm:$0xff] %v4685_v58  ;;  %vm1865_vm1 = vweird.f32 %v4569_v54  ;;  %v4729_v58 = vld [vmem:[%s4004_s7 + $0xb8] sm:$0xff]  }
 0x2b9   : > { %5644 = vst [vmem:[#allocation65_spill] sm:$0xff] %v4693_v38 }
 0x2ba   : > { %5646 = vst [vmem:[#allocation67_spill] sm:$0xff] %v4701_v22 }
 0x2bb   : > { %5647 = vst [vmem:[#allocation68_spill] sm:$0xff] %v4704_v19 }
 0x2bc   : > { %5649 = vst [vmem:[#allocation70_spill] sm:$0xff] %v4717_v30 }
 0x2bd   : > { %5650 = vst [vmem:[#allocation71_spill] sm:$0xff] %v4729_v58 }
 0x2be   : > { %v4616_v10 = vpop.eup %3601 }
 0x2bf   : > { %v1860_v41 = vmul.f32 %v4616_v10, %v4569_v54  ;;  %vm1866_vm0 = vweird.f32 %v4616_v10 }
 0x2c0   : > { %vm1867_vm2 = vmor %vm1865_vm1, %vm1866_vm0 }
 0x2c1   : > { %v1861_v63 = vmul.f32 %v4616_v10, %v1860_v41  ;;  %v4696_v41 = vld [vmem:[%s4004_s7 + $0xe0] sm:$0xff]  }
 0x2c2   : > { %5645 = vst [vmem:[#allocation66_spill] sm:$0xff] %v4696_v41  ;;  %v3276_v41 = vunpack.c.l.bf16 %v3468_v28 }
 0x2c3   : > { %v1862_v36 = vmul.f32 0.5, %v1861_v63 }
 0x2c5   : > { %v1863_v63 = vsub.f32 1.5, %v1862_v36  ;;  %v4714_v36 = vld [vmem:[%s4004_s7 + $0xb0] sm:$0xff]  }
 0x2c6   : > { %5648 = vst [vmem:[#allocation69_spill] sm:$0xff] %v4714_v36  ;;  %v5663_v36 = vld [vmem:[#allocation37_spill] sm:$0xff] }
 0x2c7   : > { %v1864_v24 = vmul.f32 %v4616_v10, %v1863_v63 }
 0x2c9   : > { %v1868_v40 = vsel %vm1867_vm2, %v4616_v10, %v1864_v24 }
 0x2ca   : > { %v1869_v17 = vmul.f32 %v1868_v40, %v1650_v44  ;;  %v5652_v40 = vld [vmem:[#allocation21_spill] sm:$0xff] }
 0x2cc   : > { %v1870_v6 = vmul.f32 %v1869_v17, %v4565_v59  ;;  %v4739_v25 = vperm.slane %v1869_v17, 0 }
 0x2ce   : > { %v1872_v22 = vrot.slane %v1870_v6, 7  ;;  %v1938_v63 = vmul.f32 %v4739_v25, %v4551_v47  ;;  %v1939_v51 = vmul.f32 %v4739_v25, %v4556_v15  ;;  %v4749_v24 = vmul.f32 %v4739_v25, %v4076_v8  ;;  %v5651_v6 = vld [vmem:[#allocation19_spill] sm:$0xff] }
 0x2cf   : > { %v4753_v59 = vmul.f32 %v4739_v25, %v4080_v26  ;;  %v4757_v17 = vmul.f32 %v4739_v25, %v4084_v33  ;;  %v4761_v28 = vmul.f32 %v4739_v25, %v4088_v49  ;;  %v4765_v47 = vmul.f32 %v4739_v25, %v4092_v57 }
 0x2d0   : > { %v1874_v15 = vsub.f32 %v1650_v44, %v1872_v22  ;;  %v4769_v8 = vmul.f32 %v4739_v25, %v4096_v12  ;;  %v4773_v26 = vmul.f32 %v4739_v25, %v4100_v21  ;;  %v4777_v33 = vmul.f32 %v4739_v25, %v5651_v6  ;;  %v5654_v22 = vld [vmem:[#allocation25_spill] sm:$0xff]  ;;  %v5655_v44 = vld [vmem:[#allocation27_spill] sm:$0xff] }
 0x2d1   : > { %v4781_v49 = vmul.f32 %v4739_v25, %v5652_v40  ;;  %v4785_v57 = vmul.f32 %v4739_v25, %v5653_v39  ;;  %v4789_v12 = vmul.f32 %v4739_v25, %v5654_v22  ;;  %v4793_v21 = vmul.f32 %v4739_v25, %v5655_v44  ;;  %v5656_v6 = vld [vmem:[#allocation29_spill] sm:$0xff]  ;;  %v5657_v40 = vld [vmem:[#allocation31_spill] sm:$0xff]  ;;  %v5661_v44 = vld [vmem:[#allocation36_spill] sm:$0xff] }
 0x2d2   : > { %v4795_v10 = vperm.slane %v1874_v15, 1  ;;  %v4799_v54 = vmul.f32 %v4739_v25, %v5656_v6  ;;  %v4803_v30 = vmul.f32 %v4739_v25, %v5657_v40  ;;  %v5658_v39 = vld [vmem:[#allocation33_spill] sm:$0xff]  ;;  %v5659_v22 = vld [vmem:[#allocation35_spill] sm:$0xff]  ;;  %v4815_v15 = vmul.f32 %v4739_v25, %v4140_v0 }
 0x2d3   : > { %v4807_v19 = vmul.f32 %v4739_v25, %v5658_v39  ;;  %v4811_v58 = vmul.f32 %v4739_v25, %v5659_v22  ;;  %v4819_v6 = vmul.f32 %v4739_v25, %v5661_v44  ;;  %v4823_v40 = vmul.f32 %v4739_v25, %v5663_v36 }
 0x2d4   : > { %5660 = vst [vmem:[#allocation19_spill] sm:$0xff] %v4815_v15  ;;  %v2003_v38 = vadd.f32 %v4795_v10, %v1938_v63  ;;  %v2004_v39 = vadd.f32 %v4795_v10, %v1939_v51  ;;  %v4829_v22 = vmul.f32 %v4739_v25, %v5665_v9  ;;  %v4833_v0 = vmul.f32 %v4739_v25, %v5667_v35  ;;  %v5675_v51 = vld [vmem:[#allocation46_spill] sm:$0xff]  ;;  %v5676_v35 = vld [vmem:[#allocation48_spill] sm:$0xff] }
 0x2d5   : > { %5662 = vst [vmem:[#allocation21_spill] sm:$0xff] %v4819_v6  ;;  %v4837_v44 = vmul.f32 %v4739_v25, %v5669_v42  ;;  %v5671_v6 = vld [vmem:[#allocation42_spill] sm:$0xff]  ;;  %v4849_v9 = vmul.f32 %v4739_v25, %v5675_v51  ;;  %v5681_v51 = vld [vmem:[#allocation56_spill] sm:$0xff] }
 0x2d6   : > { %5664 = vst [vmem:[#allocation23_spill] sm:$0xff] %v4823_v40  ;;  %v4841_v36 = vmul.f32 %v4739_v25, %v5671_v6  ;;  %v5673_v40 = vld [vmem:[#allocation44_spill] sm:$0xff]  ;;  %v2196_v15 = vadd.f32 %v3277_v23, %v2004_v39  ;;  %v5677_v42 = vld [vmem:[#allocation50_spill] sm:$0xff]  ;;  %v5682_v23 = vld [vmem:[#allocation57_spill] sm:$0xff] }
 0x2d7   : > { %5666 = vst [vmem:[#allocation25_spill] sm:$0xff] %v4829_v22  ;;  %v4845_v63 = vmul.f32 %v4739_v25, %v5673_v40  ;;  %v2195_v22 = vadd.f32 %v3276_v41, %v2003_v38  ;;  %v5678_v6 = vld [vmem:[#allocation52_spill] sm:$0xff]  ;;  %v5679_v40 = vld [vmem:[#allocation54_spill] sm:$0xff]  ;;  %v4869_v38 = vmul.f32 %v4739_v25, %v5681_v51  ;;  %v4873_v41 = vmul.f32 %v4739_v25, %v5682_v23 }
 0x2d8   : > { %5668 = vst [vmem:[#allocation27_spill] sm:$0xff] %v4833_v0  ;;  %v4853_v0 = vmul.f32 %v4739_v25, %v5676_v35  ;;  %v2260_v35 = vmax.f32 %v2196_v15, 0.0  ;;  %v4889_v51 = vmul.f32 %v4739_v25, %v4218_v2  ;;  %v4905_v23 = vmul.f32 %v4739_v25, %v4396_v55 }
 0x2d9   : > { %5670 = vst [vmem:[#allocation29_spill] sm:$0xff] %v4837_v44  ;;  %v4857_v44 = vmul.f32 %v4739_v25, %v5677_v42  ;;  %v2259_v39 = vmax.f32 %v2195_v22, 0.0  ;;  %v4877_v42 = vmul.f32 %v4739_v25, %v4200_v62  ;;  %v4893_v22 = vmul.f32 %v4739_v25, %v4224_v27 }
 0x2da   : > { %5672 = vst [vmem:[#allocation31_spill] sm:$0xff] %v4841_v36  ;;  %v4861_v36 = vmul.f32 %v4739_v25, %v5678_v6  ;;  %v4881_v6 = vmul.f32 %v4739_v25, %v4206_v18  ;;  %v4897_v62 = vmul.f32 %v4739_v25, %v4244_v32  ;;  %v4901_v18 = vmul.f32 %v4739_v25, %v4390_v11 }
 0x2db   : > { %5674 = vst [vmem:[#allocation33_spill] sm:$0xff] %v4845_v63  ;;  %v4865_v63 = vmul.f32 %v4739_v25, %v5679_v40  ;;  %v5683_v40 = vld [vmem:[#allocation58_spill] sm:$0xff]  ;;  %v3436_v15 = vpack.c.bf16 %v2260_v35, %v2259_v39  ;;  %v4909_v2 = vmul.f32 %v4739_v25, %v4408_v43  ;;  %v4913_v27 = vmul.f32 %v4739_v25, %v4414_v37 }
 0x2dc   : > { %5684 = vst [vmem:[#allocation36_spill] sm:$0xff] %v4905_v23  ;;  %v4917_v32 = vmul.f32 %v4739_v25, %v4424_v13  ;;  %v4921_v11 = vmul.f32 %v4739_v25, %v4430_v60  ;;  %v4925_v55 = vmul.f32 %v4739_v25, %v4437_v45  ;;  %v1920_v43 = vmul.f32 %v4739_v25, %v4442_v34 }
 0x2dd   : > { %5680 = vst [vmem:[#allocation35_spill] sm:$0xff] %v4865_v63  ;;  %v4885_v63 = vmul.f32 %v4739_v25, %v5683_v40  ;;  %v1921_v37 = vmul.f32 %v4739_v25, %v4447_v29  ;;  %v1922_v13 = vmul.f32 %v4739_v25, %v4452_v31  ;;  %v1923_v60 = vmul.f32 %v4739_v25, %v4461_v61  ;;  %v5691_v40 = vld [vmem:[#allocation21_spill] sm:$0xff] }
 0x2de   : > { %5685 = vst [vmem:[#allocation37_spill] sm:$0xff] %v4909_v2  ;;  %v1924_v45 = vmul.f32 %v4739_v25, %v4204_v3  ;;  %v1925_v39 = vmul.f32 %v4739_v25, %v4210_v46  ;;  %v1926_v35 = vmul.f32 %v4739_v25, %v4216_v1  ;;  %v1927_v34 = vmul.f32 %v4739_v25, %v4222_v14 }
 0x2df   : > { %5686 = vst [vmem:[#allocation38_spill] sm:$0xff] %v4913_v27  ;;  %v1928_v29 = vmul.f32 %v4739_v25, %v4239_v20  ;;  %v1929_v31 = vmul.f32 %v4739_v25, %v4482_v4  ;;  %v1930_v61 = vmul.f32 %v4739_v25, %v4490_v53  ;;  %v1931_v3 = vmul.f32 %v4739_v25, %v4498_v7 }
 0x2e0   : > { %5687 = vst [vmem:[#allocation39_spill] sm:$0xff] %v4917_v32  ;;  %v1932_v46 = vmul.f32 %v4739_v25, %v4506_v56  ;;  %v1933_v1 = vmul.f32 %v4739_v25, %v4514_v50  ;;  %v1934_v14 = vmul.f32 %v4739_v25, %v4522_v52  ;;  %v1935_v20 = vmul.f32 %v4739_v25, %v4530_v48  ;;  %v5695_v32 = vld [vmem:[#allocation29_spill] sm:$0xff] }
 0x2e1   : > { %5688 = vst [vmem:[#allocation40_spill] sm:$0xff] %v4921_v11  ;;  %v1936_v4 = vmul.f32 %v4739_v25, %v4537_v16  ;;  %v1937_v53 = vmul.f32 %v4739_v25, %v4544_v5  ;;  %v1941_v7 = vadd.f32 %v4795_v10, %v4749_v24  ;;  %v1942_v56 = vadd.f32 %v4795_v10, %v4753_v59  ;;  %v5694_v11 = vld [vmem:[#allocation27_spill] sm:$0xff] }
 0x2e2   : > { %5689 = vst [vmem:[#allocation42_spill] sm:$0xff] %v4925_v55  ;;  %v1943_v50 = vadd.f32 %v4795_v10, %v4757_v17  ;;  %v1944_v52 = vadd.f32 %v4795_v10, %v4761_v28  ;;  %v1945_v48 = vadd.f32 %v4795_v10, %v4765_v47  ;;  %v1946_v16 = vadd.f32 %v4795_v10, %v4769_v8  ;;  %v5693_v55 = vld [vmem:[#allocation25_spill] sm:$0xff]  ;;  %v5696_v27 = vld [vmem:[#allocation31_spill] sm:$0xff] }
 0x2e3   : > { %3499 = vst [vmem:[%s4929_s29 + $0xf8] sm:$0xff] %v3436_v15   ;;  %v1947_v5 = vadd.f32 %v4795_v10, %v4773_v26  ;;  %v1948_v25 = vadd.f32 %v4795_v10, %v4777_v33  ;;  %v1949_v24 = vadd.f32 %v4795_v10, %v4781_v49  ;;  %v1950_v59 = vadd.f32 %v4795_v10, %v4785_v57  ;;  %v5690_v49 = vld [vmem:[#allocation19_spill] sm:$0xff]  ;;  %v5697_v2 = vld [vmem:[#allocation33_spill] sm:$0xff] }
 0x2e4   : > { %v1951_v17 = vadd.f32 %v4795_v10, %v4789_v12  ;;  %v1952_v28 = vadd.f32 %v4795_v10, %v4793_v21  ;;  %v1953_v47 = vadd.f32 %v4795_v10, %v4799_v54  ;;  %v1954_v8 = vadd.f32 %v4795_v10, %v4803_v30  ;;  %v5692_v15 = vld [vmem:[#allocation23_spill] sm:$0xff] }
 0x2e5   : > { %v1955_v26 = vadd.f32 %v4795_v10, %v4807_v19  ;;  %v1956_v33 = vadd.f32 %v4795_v10, %v4811_v58  ;;  %v1957_v57 = vadd.f32 %v4795_v10, %v5690_v49  ;;  %v1958_v12 = vadd.f32 %v4795_v10, %v5691_v40  ;;  %v5698_v23 = vld [vmem:[#allocation35_spill] sm:$0xff] }
 0x2e6   : > { %v1959_v21 = vadd.f32 %v4795_v10, %v5692_v15  ;;  %v1960_v54 = vadd.f32 %v4795_v10, %v5693_v55  ;;  %v1961_v30 = vadd.f32 %v4795_v10, %v5694_v11  ;;  %v1962_v19 = vadd.f32 %v4795_v10, %v5695_v32 }
 0x2e7   : > { %v1963_v58 = vadd.f32 %v4795_v10, %v5696_v27  ;;  %v1964_v49 = vadd.f32 %v4795_v10, %v5697_v2  ;;  %v1965_v40 = vadd.f32 %v4795_v10, %v4849_v9  ;;  %v1966_v15 = vadd.f32 %v4795_v10, %v4853_v0 }
 0x2e8   : > { %v1967_v55 = vadd.f32 %v4795_v10, %v4857_v44  ;;  %v1968_v11 = vadd.f32 %v4795_v10, %v4861_v36  ;;  %v1969_v32 = vadd.f32 %v4795_v10, %v5698_v23  ;;  %v1970_v27 = vadd.f32 %v4795_v10, %v4869_v38 }
 0x2e9   : > { %v1971_v2 = vadd.f32 %v4795_v10, %v4873_v41  ;;  %v1972_v9 = vadd.f32 %v4795_v10, %v4877_v42  ;;  %v1973_v0 = vadd.f32 %v4795_v10, %v4881_v6  ;;  %v1974_v44 = vadd.f32 %v4795_v10, %v4885_v63  ;;  %v5699_v42 = vld [vmem:[#allocation36_spill] sm:$0xff]  ;;  %v5700_v63 = vld [vmem:[#allocation37_spill] sm:$0xff] }
 0x2ea   : > { %v1975_v36 = vadd.f32 %v4795_v10, %v4889_v51  ;;  %v1976_v23 = vadd.f32 %v4795_v10, %v4893_v22  ;;  %v1977_v38 = vadd.f32 %v4795_v10, %v4897_v62  ;;  %v1978_v41 = vadd.f32 %v4795_v10, %v4901_v18  ;;  %v5701_v22 = vld [vmem:[#allocation38_spill] sm:$0xff]  ;;  %v5702_v18 = vld [vmem:[#allocation39_spill] sm:$0xff] }
 0x2eb   : > { %v1979_v6 = vadd.f32 %v4795_v10, %v5699_v42  ;;  %v1980_v51 = vadd.f32 %v4795_v10, %v5700_v63  ;;  %v1981_v62 = vadd.f32 %v4795_v10, %v5701_v22  ;;  %v1982_v42 = vadd.f32 %v4795_v10, %v5702_v18  ;;  %v5703_v63 = vld [vmem:[#allocation40_spill] sm:$0xff]  ;;  %v5704_v18 = vld [vmem:[#allocation42_spill] sm:$0xff] }
 0x2ec   : > { %v1983_v22 = vadd.f32 %v4795_v10, %v5703_v63  ;;  %v1984_v63 = vadd.f32 %v4795_v10, %v5704_v18  ;;  %v1985_v18 = vadd.f32 %v4795_v10, %v1920_v43  ;;  %v1986_v43 = vadd.f32 %v4795_v10, %v1921_v37 }
 0x2ed   : > { %v1987_v37 = vadd.f32 %v4795_v10, %v1922_v13  ;;  %v1988_v13 = vadd.f32 %v4795_v10, %v1923_v60  ;;  %v1989_v60 = vadd.f32 %v4795_v10, %v1924_v45  ;;  %v1990_v45 = vadd.f32 %v4795_v10, %v1925_v39 }
 0x2ee   : > { %v1991_v39 = vadd.f32 %v4795_v10, %v1926_v35  ;;  %v1992_v35 = vadd.f32 %v4795_v10, %v1927_v34  ;;  %v1993_v34 = vadd.f32 %v4795_v10, %v1928_v29  ;;  %v1994_v29 = vadd.f32 %v4795_v10, %v1929_v31 }
 0x2ef   : > { %v1995_v31 = vadd.f32 %v4795_v10, %v1930_v61  ;;  %v1996_v61 = vadd.f32 %v4795_v10, %v1931_v3  ;;  %v1997_v3 = vadd.f32 %v4795_v10, %v1932_v46  ;;  %v1998_v46 = vadd.f32 %v4795_v10, %v1933_v1 }
 0x2f0   : > { %v1999_v1 = vadd.f32 %v4795_v10, %v1934_v14  ;;  %v2000_v14 = vadd.f32 %v4795_v10, %v1935_v20  ;;  %v2001_v20 = vadd.f32 %v4795_v10, %v1936_v4  ;;  %v2002_v4 = vadd.f32 %v4795_v10, %v1937_v53  ;;  %v5705_v10 = vld [vmem:[#allocation17_spill] sm:$0xff] }
 0x2f1   : > { %v5706_v53 = vunpack.c.l.bf16 %v5705_v10 }
 0x2f3   : > { %v5076_v10 = vadd.f32 %v5706_v53, %v1941_v7  ;;  %v5708_v7 = vld [vmem:[#allocation17_spill] sm:$0xff] }
 0x2f4   : > { %v5709_v53 = vunpack.c.h.bf16 %v5708_v7  ;;  %v5711_v7 = vld [vmem:[#allocation41_spill] sm:$0xff] }
 0x2f5   : > { %5707 = vst [vmem:[#allocation44_spill] sm:$0xff] %v5076_v10 }
 0x2f6   : > { %v5080_v10 = vadd.f32 %v5709_v53, %v1942_v56  ;;  %v5712_v53 = vunpack.c.l.bf16 %v5711_v7 }
 0x2f8   : > { %5710 = vst [vmem:[#allocation46_spill] sm:$0xff] %v5080_v10  ;;  %v5084_v56 = vadd.f32 %v5712_v53, %v1943_v50  ;;  %v5714_v10 = vunpack.c.h.bf16 %v5711_v7  ;;  %v5716_v53 = vld [vmem:[#allocation18_spill] sm:$0xff] }
 0x2fa   : > { %5713 = vst [vmem:[#allocation48_spill] sm:$0xff] %v5084_v56  ;;  %v5088_v50 = vadd.f32 %v5714_v10, %v1944_v52  ;;  %v5717_v56 = vunpack.c.l.bf16 %v5716_v53  ;;  %v5719_v10 = vunpack.c.h.bf16 %v5716_v53 }
 0x2fc   : > { %5715 = vst [vmem:[#allocation50_spill] sm:$0xff] %v5088_v50  ;;  %v5092_v7 = vadd.f32 %v5717_v56, %v1945_v48  ;;  %v5096_v52 = vadd.f32 %v5719_v10, %v1946_v16  ;;  %v5721_v50 = vld [vmem:[#allocation43_spill] sm:$0xff]  ;;  %v5726_v10 = vld [vmem:[#allocation20_spill] sm:$0xff] }
 0x2fd   : > { %v5722_v48 = vunpack.c.l.bf16 %v5721_v50  ;;  %v5727_v16 = vunpack.c.l.bf16 %v5726_v10 }
 0x2fe   : > { %5718 = vst [vmem:[#allocation52_spill] sm:$0xff] %v5092_v7  ;;  %v5724_v7 = vunpack.c.h.bf16 %v5721_v50 }
 0x2ff   : > { %5720 = vst [vmem:[#allocation54_spill] sm:$0xff] %v5096_v52  ;;  %v5100_v56 = vadd.f32 %v5722_v48, %v1947_v5  ;;  %v5108_v52 = vadd.f32 %v5727_v16, %v1949_v24  ;;  %v5729_v5 = vunpack.c.h.bf16 %v5726_v10  ;;  %v5736_v16 = vld [vmem:[#allocation22_spill] sm:$0xff] }
 0x300   : > { %v5104_v53 = vadd.f32 %v5724_v7, %v1948_v25  ;;  %v5737_v24 = vunpack.c.l.bf16 %v5736_v16  ;;  %v5738_v10 = vunpack.c.h.bf16 %v5736_v16 }
 0x301   : > { %5723 = vst [vmem:[#allocation56_spill] sm:$0xff] %v5100_v56  ;;  %v5112_v48 = vadd.f32 %v5729_v5, %v1950_v59  ;;  %v5731_v56 = vld [vmem:[#allocation45_spill] sm:$0xff]  ;;  %v5739_v59 = vld [vmem:[#allocation47_spill] sm:$0xff] }
 0x302   : > { %5725 = vst [vmem:[#allocation57_spill] sm:$0xff] %v5104_v53  ;;  %v5732_v50 = vunpack.c.l.bf16 %v5731_v56  ;;  %v5734_v25 = vunpack.c.h.bf16 %v5731_v56  ;;  %v5128_v5 = vadd.f32 %v5738_v10, %v1954_v8  ;;  %v5742_v56 = vld [vmem:[#allocation24_spill] sm:$0xff] }
 0x303   : > { %5728 = vst [vmem:[#allocation58_spill] sm:$0xff] %v5108_v52  ;;  %v5124_v52 = vadd.f32 %v5737_v24, %v1953_v47  ;;  %v5745_v24 = vld [vmem:[#allocation49_spill] sm:$0xff] }
 0x304   : > { %5730 = vst [vmem:[#allocation19_spill] sm:$0xff] %v5112_v48  ;;  %v5116_v7 = vadd.f32 %v5732_v50, %v1951_v17  ;;  %v5120_v53 = vadd.f32 %v5734_v25, %v1952_v28  ;;  %v5740_v48 = vunpack.c.l.bf16 %v5739_v59  ;;  %v5741_v50 = vunpack.c.h.bf16 %v5739_v59 }
 0x305   : > { %v5743_v25 = vunpack.c.l.bf16 %v5742_v56  ;;  %v5746_v16 = vunpack.c.l.bf16 %v5745_v24  ;;  %v5747_v10 = vunpack.c.h.bf16 %v5745_v24 }
 0x306   : > { %5733 = vst [vmem:[#allocation21_spill] sm:$0xff] %v5116_v7  ;;  %v5132_v17 = vadd.f32 %v5740_v48, %v1955_v26  ;;  %v5136_v7 = vadd.f32 %v5741_v50, %v1956_v33  ;;  %v5748_v48 = vld [vmem:[#allocation26_spill] sm:$0xff] }
 0x307   : > { %5735 = vst [vmem:[#allocation23_spill] sm:$0xff] %v5120_v53  ;;  %v5140_v28 = vadd.f32 %v5743_v25, %v1957_v57  ;;  %v5744_v53 = vunpack.c.h.bf16 %v5742_v56  ;;  %v5148_v8 = vadd.f32 %v5746_v16, %v1959_v21  ;;  %v5152_v26 = vadd.f32 %v5747_v10, %v1960_v54  ;;  %v5751_v25 = vld [vmem:[#allocation51_spill] sm:$0xff]  ;;  %v5754_v16 = vld [vmem:[#allocation28_spill] sm:$0xff] }
 0x308   : > { %v5749_v59 = vunpack.c.l.bf16 %v5748_v48  ;;  %v5750_v50 = vunpack.c.h.bf16 %v5748_v48  ;;  %v5752_v56 = vunpack.c.l.bf16 %v5751_v25  ;;  %v5755_v24 = vunpack.c.l.bf16 %v5754_v16 }
 0x309   : > { %v5144_v47 = vadd.f32 %v5744_v53, %v1958_v12  ;;  %v5753_v53 = vunpack.c.h.bf16 %v5751_v25  ;;  %v5756_v10 = vunpack.c.h.bf16 %v5754_v16 }
 0x30a   : > { %v5156_v33 = vadd.f32 %v5749_v59, %v1961_v30  ;;  %v5160_v57 = vadd.f32 %v5750_v50, %v1962_v19  ;;  %v5164_v12 = vadd.f32 %v5752_v56, %v1963_v58  ;;  %v5172_v54 = vadd.f32 %v5755_v24, %v1965_v40  ;;  %v5757_v59 = vld [vmem:[#allocation53_spill] sm:$0xff]  ;;  %v5760_v56 = vld [vmem:[#allocation30_spill] sm:$0xff]  ;;  %v5763_v24 = vld [vmem:[#allocation55_spill] sm:$0xff] }
 0x30b   : > { %v5168_v21 = vadd.f32 %v5753_v53, %v1964_v49  ;;  %v5176_v30 = vadd.f32 %v5756_v10, %v1966_v15  ;;  %v5758_v48 = vunpack.c.l.bf16 %v5757_v59  ;;  %v5759_v50 = vunpack.c.h.bf16 %v5757_v59 }
 0x30c   : > { %v5761_v25 = vunpack.c.l.bf16 %v5760_v56  ;;  %v5762_v53 = vunpack.c.h.bf16 %v5760_v56  ;;  %v5764_v16 = vunpack.c.l.bf16 %v5763_v24  ;;  %v5765_v10 = vunpack.c.h.bf16 %v5763_v24 }
 0x30d   : > { %v5180_v19 = vadd.f32 %v5758_v48, %v1967_v55  ;;  %v5184_v58 = vadd.f32 %v5759_v50, %v1968_v11  ;;  %v5766_v48 = vld [vmem:[#allocation32_spill] sm:$0xff] }
 0x30e   : > { %v5188_v49 = vadd.f32 %v5761_v25, %v1969_v32  ;;  %v5192_v40 = vadd.f32 %v5762_v53, %v1970_v27  ;;  %v5196_v15 = vadd.f32 %v5764_v16, %v1971_v2  ;;  %v5200_v55 = vadd.f32 %v5765_v10, %v1972_v9  ;;  %v5769_v25 = vld [vmem:[#allocation59_spill] sm:$0xff]  ;;  %v5772_v16 = vld [vmem:[#allocation61_spill] sm:$0xff] }
 0x30f   : > { %v5767_v59 = vunpack.c.l.bf16 %v5766_v48  ;;  %v5768_v50 = vunpack.c.h.bf16 %v5766_v48  ;;  %v5770_v56 = vunpack.c.l.bf16 %v5769_v25  ;;  %v5771_v53 = vunpack.c.h.bf16 %v5769_v25 }
 0x310   : > { %v5773_v24 = vunpack.c.l.bf16 %v5772_v16  ;;  %v5774_v10 = vunpack.c.h.bf16 %v5772_v16 }
 0x311   : > { %v5204_v11 = vadd.f32 %v5767_v59, %v1973_v0  ;;  %v5208_v32 = vadd.f32 %v5768_v50, %v1974_v44  ;;  %v5212_v27 = vadd.f32 %v5770_v56, %v1975_v36  ;;  %v5216_v2 = vadd.f32 %v5771_v53, %v1976_v23  ;;  %v5775_v59 = vld [vmem:[#allocation63_spill] sm:$0xff]  ;;  %v5778_v56 = vld [vmem:[#allocation65_spill] sm:$0xff] }
 0x312   : > { %v5220_v9 = vadd.f32 %v5773_v24, %v1977_v38  ;;  %v5224_v0 = vadd.f32 %v5774_v10, %v1978_v41  ;;  %v5776_v48 = vunpack.c.l.bf16 %v5775_v59  ;;  %v5777_v50 = vunpack.c.h.bf16 %v5775_v59  ;;  %v5781_v24 = vld [vmem:[#allocation67_spill] sm:$0xff] }
 0x313   : > { %v5779_v25 = vunpack.c.l.bf16 %v5778_v56  ;;  %v5780_v53 = vunpack.c.h.bf16 %v5778_v56  ;;  %v5782_v16 = vunpack.c.l.bf16 %v5781_v24  ;;  %v5783_v10 = vunpack.c.h.bf16 %v5781_v24 }
 0x314   : > { %v5228_v44 = vadd.f32 %v5776_v48, %v1979_v6  ;;  %v5232_v36 = vadd.f32 %v5777_v50, %v1980_v51  ;;  %v5784_v48 = vld [vmem:[#allocation69_spill] sm:$0xff] }
 0x315   : > { %v5236_v23 = vadd.f32 %v5779_v25, %v1981_v62  ;;  %v5240_v38 = vadd.f32 %v5780_v53, %v1982_v42  ;;  %v5244_v41 = vadd.f32 %v5782_v16, %v1983_v22  ;;  %v5248_v6 = vadd.f32 %v5783_v10, %v1984_v63  ;;  %v5787_v25 = vld [vmem:[#allocation71_spill] sm:$0xff]  ;;  %v5790_v16 = vld [vmem:[#allocation34_spill] sm:$0xff] }
 0x316   : > { %v5785_v59 = vunpack.c.l.bf16 %v5784_v48  ;;  %v5786_v50 = vunpack.c.h.bf16 %v5784_v48  ;;  %v5788_v56 = vunpack.c.l.bf16 %v5787_v25  ;;  %v5789_v53 = vunpack.c.h.bf16 %v5787_v25 }
 0x317   : > { %v5791_v24 = vunpack.c.l.bf16 %v5790_v16  ;;  %v5792_v10 = vunpack.c.h.bf16 %v5790_v16 }
 0x318   : > { %v5252_v51 = vadd.f32 %v5785_v59, %v1985_v18  ;;  %v5256_v62 = vadd.f32 %v5786_v50, %v1986_v43  ;;  %v5260_v42 = vadd.f32 %v5788_v56, %v1987_v37  ;;  %v5264_v22 = vadd.f32 %v5789_v53, %v1988_v13  ;;  %v5793_v59 = vld [vmem:[#allocation60_spill] sm:$0xff]  ;;  %v5796_v56 = vld [vmem:[#allocation62_spill] sm:$0xff] }
 0x319   : > { %v5268_v63 = vadd.f32 %v5791_v24, %v1989_v60  ;;  %v5272_v18 = vadd.f32 %v5792_v10, %v1990_v45  ;;  %v5794_v48 = vunpack.c.l.bf16 %v5793_v59  ;;  %v5795_v50 = vunpack.c.h.bf16 %v5793_v59  ;;  %v5799_v24 = vld [vmem:[#allocation64_spill] sm:$0xff] }
 0x31a   : > { %v5797_v25 = vunpack.c.l.bf16 %v5796_v56  ;;  %v5798_v53 = vunpack.c.h.bf16 %v5796_v56  ;;  %v5800_v16 = vunpack.c.l.bf16 %v5799_v24  ;;  %v5802_v10 = vunpack.c.h.bf16 %v5799_v24 }
 0x31b   : > { %v5276_v43 = vadd.f32 %v5794_v48, %v1991_v39  ;;  %v5280_v37 = vadd.f32 %v5795_v50, %v1992_v35  ;;  %v5804_v48 = vld [vmem:[#allocation66_spill] sm:$0xff] }
 0x31c   : > { %v5284_v13 = vadd.f32 %v5797_v25, %v1993_v34  ;;  %v5288_v60 = vadd.f32 %v5798_v53, %v1994_v29  ;;  %v5292_v45 = vadd.f32 %v5800_v16, %v1995_v31  ;;  %v5296_v39 = vadd.f32 %v5802_v10, %v1996_v61  ;;  %v5809_v25 = vld [vmem:[#allocation68_spill] sm:$0xff]  ;;  %v5814_v16 = vld [vmem:[#allocation70_spill] sm:$0xff] }
 0x31d   : > { %v5805_v59 = vunpack.c.l.bf16 %v5804_v48  ;;  %v5807_v50 = vunpack.c.h.bf16 %v5804_v48  ;;  %v5810_v56 = vunpack.c.l.bf16 %v5809_v25  ;;  %v5812_v53 = vunpack.c.h.bf16 %v5809_v25 }
 0x31e   : > { %5801 = vst [vmem:[#allocation25_spill] sm:$0xff] %v5292_v45  ;;  %v5815_v24 = vunpack.c.l.bf16 %v5814_v16  ;;  %v5817_v10 = vunpack.c.h.bf16 %v5814_v16  ;;  %v5830_v45 = vld [vmem:[#allocation23_spill] sm:$0xff] }
 0x31f   : > { %5803 = vst [vmem:[#allocation27_spill] sm:$0xff] %v5296_v39  ;;  %v5300_v35 = vadd.f32 %v5805_v59, %v1997_v3  ;;  %v5304_v34 = vadd.f32 %v5807_v50, %v1998_v46  ;;  %v5308_v29 = vadd.f32 %v5810_v56, %v1999_v1  ;;  %v5312_v31 = vadd.f32 %v5812_v53, %v2000_v14  ;;  %v5819_v59 = vld [vmem:[#allocation44_spill] sm:$0xff]  ;;  %v5820_v46 = vld [vmem:[#allocation46_spill] sm:$0xff] }
 0x320   : > { %v5316_v61 = vadd.f32 %v5815_v24, %v2001_v20  ;;  %v5320_v3 = vadd.f32 %v5817_v10, %v2002_v4  ;;  %v2197_v48 = vmax.f32 %v5819_v59, 0.0  ;;  %v2198_v50 = vmax.f32 %v5820_v46, 0.0  ;;  %v5822_v1 = vld [vmem:[#allocation50_spill] sm:$0xff]  ;;  %v5826_v20 = vld [vmem:[#allocation57_spill] sm:$0xff]  ;;  %v5828_v4 = vld [vmem:[#allocation19_spill] sm:$0xff] }
 0x321   : > { %5806 = vst [vmem:[#allocation29_spill] sm:$0xff] %v5300_v35  ;;  %v2200_v56 = vmax.f32 %v5822_v1, 0.0  ;;  %v5824_v14 = vld [vmem:[#allocation54_spill] sm:$0xff]  ;;  %v2204_v24 = vmax.f32 %v5826_v20, 0.0  ;;  %v2206_v10 = vmax.f32 %v5828_v4, 0.0  ;;  %v2208_v46 = vmax.f32 %v5830_v45, 0.0 }
 0x322   : > { %5808 = vst [vmem:[#allocation31_spill] sm:$0xff] %v5304_v34  ;;  %v5821_v34 = vld [vmem:[#allocation48_spill] sm:$0xff]  ;;  %v2202_v53 = vmax.f32 %v5824_v14, 0.0  ;;  %v2210_v1 = vmax.f32 %v5128_v5, 0.0  ;;  %v2212_v14 = vmax.f32 %v5136_v7, 0.0  ;;  %v2214_v20 = vmax.f32 %v5144_v47, 0.0 }
 0x323   : > { %5811 = vst [vmem:[#allocation33_spill] sm:$0xff] %v5308_v29  ;;  %v2199_v35 = vmax.f32 %v5821_v34, 0.0  ;;  %v5823_v29 = vld [vmem:[#allocation52_spill] sm:$0xff]  ;;  %v2209_v34 = vmax.f32 %v5124_v52, 0.0  ;;  %v2216_v4 = vmax.f32 %v5152_v26, 0.0  ;;  %v2218_v45 = vmax.f32 %v5160_v57, 0.0 }
 0x324   : > { %5813 = vst [vmem:[#allocation35_spill] sm:$0xff] %v5312_v31  ;;  %v2201_v25 = vmax.f32 %v5823_v29, 0.0  ;;  %v5825_v31 = vld [vmem:[#allocation56_spill] sm:$0xff]  ;;  %v2211_v29 = vmax.f32 %v5132_v17, 0.0  ;;  %v2219_v52 = vmax.f32 %v5164_v12, 0.0  ;;  %v2220_v5 = vmax.f32 %v5168_v21, 0.0 }
 0x325   : > { %5816 = vst [vmem:[#allocation36_spill] sm:$0xff] %v5316_v61  ;;  %v2203_v39 = vmax.f32 %v5825_v31, 0.0  ;;  %v5827_v61 = vld [vmem:[#allocation58_spill] sm:$0xff]  ;;  %v2213_v31 = vmax.f32 %v5140_v28, 0.0  ;;  %v2221_v17 = vmax.f32 %v5172_v54, 0.0  ;;  %v2222_v7 = vmax.f32 %v5176_v30, 0.0 }
 0x326   : > { %5818 = vst [vmem:[#allocation37_spill] sm:$0xff] %v5320_v3  ;;  %v2205_v16 = vmax.f32 %v5827_v61, 0.0  ;;  %v5829_v3 = vld [vmem:[#allocation21_spill] sm:$0xff]  ;;  %v2215_v61 = vmax.f32 %v5148_v8, 0.0  ;;  %v2223_v28 = vmax.f32 %v5180_v19, 0.0  ;;  %v2224_v47 = vmax.f32 %v5184_v58, 0.0 }
 0x327   : > { %v2207_v59 = vmax.f32 %v5829_v3, 0.0  ;;  %v2217_v3 = vmax.f32 %v5156_v33, 0.0  ;;  %v2225_v8 = vmax.f32 %v5188_v49, 0.0  ;;  %v2226_v26 = vmax.f32 %v5192_v40, 0.0 }
 0x328   : > { %v2227_v33 = vmax.f32 %v5196_v15, 0.0  ;;  %v2228_v57 = vmax.f32 %v5200_v55, 0.0  ;;  %v2229_v12 = vmax.f32 %v5204_v11, 0.0  ;;  %v2230_v21 = vmax.f32 %v5208_v32, 0.0 }
 0x329   : > { %v2231_v54 = vmax.f32 %v5212_v27, 0.0  ;;  %v2232_v30 = vmax.f32 %v5216_v2, 0.0  ;;  %v2233_v19 = vmax.f32 %v5220_v9, 0.0  ;;  %v2234_v58 = vmax.f32 %v5224_v0, 0.0 }
 0x32a   : > { %v2235_v49 = vmax.f32 %v5228_v44, 0.0  ;;  %v2236_v40 = vmax.f32 %v5232_v36, 0.0  ;;  %v2237_v15 = vmax.f32 %v5236_v23, 0.0  ;;  %v2238_v55 = vmax.f32 %v5240_v38, 0.0 }
 0x32b   : > { %v2239_v11 = vmax.f32 %v5244_v41, 0.0  ;;  %v2240_v32 = vmax.f32 %v5248_v6, 0.0  ;;  %v2241_v27 = vmax.f32 %v5252_v51, 0.0  ;;  %v2242_v2 = vmax.f32 %v5256_v62, 0.0  ;;  %v5831_v51 = vld [vmem:[#allocation25_spill] sm:$0xff] }
 0x32c   : > { %v2243_v9 = vmax.f32 %v5260_v42, 0.0  ;;  %v2244_v0 = vmax.f32 %v5264_v22, 0.0  ;;  %v2245_v44 = vmax.f32 %v5268_v63, 0.0  ;;  %v2246_v36 = vmax.f32 %v5272_v18, 0.0  ;;  %v5832_v42 = vld [vmem:[#allocation27_spill] sm:$0xff]  ;;  %v5833_v63 = vld [vmem:[#allocation29_spill] sm:$0xff] }
 0x32d   : > { %v2247_v23 = vmax.f32 %v5276_v43, 0.0  ;;  %v2248_v38 = vmax.f32 %v5280_v37, 0.0  ;;  %v2249_v41 = vmax.f32 %v5284_v13, 0.0  ;;  %v2250_v6 = vmax.f32 %v5288_v60, 0.0  ;;  %v5834_v43 = vld [vmem:[#allocation31_spill] sm:$0xff]  ;;  %v5835_v13 = vld [vmem:[#allocation33_spill] sm:$0xff] }
 0x32e   : > { %v2251_v62 = vmax.f32 %v5831_v51, 0.0  ;;  %v2252_v22 = vmax.f32 %v5832_v42, 0.0  ;;  %v2253_v18 = vmax.f32 %v5833_v63, 0.0  ;;  %v2254_v37 = vmax.f32 %v5834_v43, 0.0  ;;  %v5836_v51 = vld [vmem:[#allocation35_spill] sm:$0xff]  ;;  %v5837_v63 = vld [vmem:[#allocation36_spill] sm:$0xff] }
 0x32f   : > { %v2255_v60 = vmax.f32 %v5835_v13, 0.0  ;;  %v2256_v42 = vmax.f32 %v5836_v51, 0.0  ;;  %v2257_v43 = vmax.f32 %v5837_v63, 0.0  ;;  %v5838_v13 = vld [vmem:[#allocation37_spill] sm:$0xff]  ;;  %v3281_v63 = vpack.c.bf16 %v2198_v50, %v2197_v48 }
 0x330   : > { %v2258_v51 = vmax.f32 %v5838_v13, 0.0  ;;  %v3286_v13 = vpack.c.bf16 %v2200_v56, %v2199_v35  ;;  %v3291_v48 = vpack.c.bf16 %v2202_v53, %v2201_v25  ;;  %v3296_v50 = vpack.c.bf16 %v2204_v24, %v2203_v39 }
 0x331   : > { %v3301_v35 = vpack.c.bf16 %v2206_v10, %v2205_v16  ;;  %v3306_v56 = vpack.c.bf16 %v2208_v46, %v2207_v59  ;;  %v3311_v25 = vpack.c.bf16 %v2210_v1, %v2209_v34  ;;  %v3316_v53 = vpack.c.bf16 %v2212_v14, %v2211_v29  ;;  %3282 = vst [vmem:[%s4929_s29] sm:$0xff] %v3281_v63  }
 0x332   : > { %v3321_v24 = vpack.c.bf16 %v2214_v20, %v2213_v31  ;;  %v3326_v39 = vpack.c.bf16 %v2216_v4, %v2215_v61  ;;  %v3331_v10 = vpack.c.bf16 %v2218_v45, %v2217_v3  ;;  %v3336_v16 = vpack.c.bf16 %v2220_v5, %v2219_v52  ;;  %3469 = vst [vmem:[%s4929_s29 + $0x8] sm:$0xff] %v3286_v13  }
 0x333   : > { %v3341_v46 = vpack.c.bf16 %v2222_v7, %v2221_v17  ;;  %v3346_v59 = vpack.c.bf16 %v2224_v47, %v2223_v28  ;;  %v3351_v1 = vpack.c.bf16 %v2226_v26, %v2225_v8  ;;  %v3356_v34 = vpack.c.bf16 %v2228_v57, %v2227_v33  ;;  %3470 = vst [vmem:[%s4929_s29 + $0x10] sm:$0xff] %v3291_v48  }
 0x334   : > { %v3361_v14 = vpack.c.bf16 %v2230_v21, %v2229_v12  ;;  %v3366_v29 = vpack.c.bf16 %v2232_v30, %v2231_v54  ;;  %v3371_v63 = vpack.c.bf16 %v2234_v58, %v2233_v19  ;;  %v3376_v20 = vpack.c.bf16 %v2236_v40, %v2235_v49  ;;  %3471 = vst [vmem:[%s4929_s29 + $0x18] sm:$0xff] %v3296_v50  }
 0x335   : > { %v3381_v31 = vpack.c.bf16 %v2238_v55, %v2237_v15  ;;  %v3386_v61 = vpack.c.bf16 %v2240_v32, %v2239_v11  ;;  %v3391_v4 = vpack.c.bf16 %v2242_v2, %v2241_v27  ;;  %v3396_v3 = vpack.c.bf16 %v2244_v0, %v2243_v9  ;;  %3472 = vst [vmem:[%s4929_s29 + $0x20] sm:$0xff] %v3301_v35  }
 0x336   : > { %v3401_v45 = vpack.c.bf16 %v2246_v36, %v2245_v44  ;;  %v3406_v52 = vpack.c.bf16 %v2248_v38, %v2247_v23  ;;  %v3411_v5 = vpack.c.bf16 %v2250_v6, %v2249_v41  ;;  %v3416_v17 = vpack.c.bf16 %v2252_v22, %v2251_v62  ;;  %3473 = vst [vmem:[%s4929_s29 + $0x28] sm:$0xff] %v3306_v56  }
 0x337   : > { %v3421_v7 = vpack.c.bf16 %v2254_v37, %v2253_v18  ;;  %v3426_v28 = vpack.c.bf16 %v2256_v42, %v2255_v60  ;;  %v3431_v47 = vpack.c.bf16 %v2258_v51, %v2257_v43  ;;  %3474 = vst [vmem:[%s4929_s29 + $0x30] sm:$0xff] %v3311_v25  }
 0x338   : > { %3475 = vst [vmem:[%s4929_s29 + $0x38] sm:$0xff] %v3316_v53  }
 0x339   : > { %3476 = vst [vmem:[%s4929_s29 + $0x40] sm:$0xff] %v3321_v24  }
 0x33a   : > { %3477 = vst [vmem:[%s4929_s29 + $0x48] sm:$0xff] %v3326_v39  }
 0x33b   : > { %3478 = vst [vmem:[%s4929_s29 + $0x50] sm:$0xff] %v3331_v10  }
 0x33c   : > { %3479 = vst [vmem:[%s4929_s29 + $0x58] sm:$0xff] %v3336_v16  }
 0x33d   : > { %3480 = vst [vmem:[%s4929_s29 + $0x60] sm:$0xff] %v3341_v46  }
 0x33e   : > { %3481 = vst [vmem:[%s4929_s29 + $0x68] sm:$0xff] %v3346_v59  }
 0x33f   : > { %3482 = vst [vmem:[%s4929_s29 + $0x70] sm:$0xff] %v3351_v1  }
 0x340   : > { %3483 = vst [vmem:[%s4929_s29 + $0x78] sm:$0xff] %v3356_v34  }
 0x341   : > { %3484 = vst [vmem:[%s4929_s29 + $0x80] sm:$0xff] %v3361_v14  }
 0x342   : > { %3485 = vst [vmem:[%s4929_s29 + $0x88] sm:$0xff] %v3366_v29  }
 0x343   : > { %3486 = vst [vmem:[%s4929_s29 + $0x90] sm:$0xff] %v3371_v63  }
 0x344   : > { %3487 = vst [vmem:[%s4929_s29 + $0x98] sm:$0xff] %v3376_v20  }
 0x345   : > { %3488 = vst [vmem:[%s4929_s29 + $0xa0] sm:$0xff] %v3381_v31  }
 0x346   : > { %3489 = vst [vmem:[%s4929_s29 + $0xa8] sm:$0xff] %v3386_v61  }
 0x347   : > { %3490 = vst [vmem:[%s4929_s29 + $0xb0] sm:$0xff] %v3391_v4  }
 0x348   : > { %3491 = vst [vmem:[%s4929_s29 + $0xb8] sm:$0xff] %v3396_v3  }
 0x349   : > { %3492 = vst [vmem:[%s4929_s29 + $0xc0] sm:$0xff] %v3401_v45  }
 0x34a   : > { %3493 = vst [vmem:[%s4929_s29 + $0xc8] sm:$0xff] %v3406_v52  }
 0x34b   : > { %3494 = vst [vmem:[%s4929_s29 + $0xd0] sm:$0xff] %v3411_v5  }
 0x34c   : > { %3495 = vst [vmem:[%s4929_s29 + $0xd8] sm:$0xff] %v3416_v17  }
 0x34d   : > { %3496 = vst [vmem:[%s4929_s29 + $0xe0] sm:$0xff] %v3421_v7  }
 0x34e   : > { %3497 = vst [vmem:[%s4929_s29 + $0xe8] sm:$0xff] %v3426_v28  }
 0x34f   : > { %3498 = vst [vmem:[%s4929_s29 + $0xf0] sm:$0xff] %v3431_v47  }
 0x350   : > { %3750 = shalt.err (!%p3747_p5)
}
 0x351   : > { %s3805_s17 = smov 64   ;;  %s3806_s10 = smov 128  }
 0x352   : > { %s3807_s11 = smov 4  }
 0x353   : > { %3536 = dma.vmem_to_hbm [thread:$0]  (%p3922_p11), %s2402_s25, 4096, %s2404_s21, %s2390_s27, %s3805_s17, %s3806_s10, %s3807_s11  }
 0x354 PF: > { %s2418_s13 = sand.u32 1, %s3785_s15   ;;  %p5839_p7 = scmp.ge.s32.totalorder %s3797_s18, 2 }
 0x355   : > { %s2419_s1 = scalar_lea.sflag [#allocation4], %s2418_s13 }
 0x356   : > { %p3553_p9 = pnand %p5839_p7, %p3926_p12 }
 0x358   : > { %p3554_p13 = pneg %p3553_p9 }
 0x35a   : > { %3780 = dma.done.wait (%p3554_p13), %s2419_s1, 4096  }
 0x35b   : > { %3782 = vsyncadd (%p3554_p13), %s2419_s1, 4294963200  ;;  %s5840_s14 = sld [smem:[#allocation15_spill]]  ;;  %p21_p0 = scmp.ge.s32.totalorder %s3854_s19, 4  }
 0x35c   : > { %s5841_s17 = sld [smem:[#allocation16_spill]]  ;;  %s5842_s15 = smov %s3789_s16 }
 0x35d   : > { %s5844_s18 = smov %s3854_s19  ;;  %23 = sbr.rel (!%p21_p0) target bundleno = 11 (0xb), region = 110 }
 0x361   : > { %s5843_s16 = smov %s5840_s14 }
 0x362   :  { %2425 = vsyncpa [#allocation3], 1 }
 0x363   :  { %2427 = vsyncpa [#allocation3 + $0x1], 1 }
 0x364   :  { %2428 = vsyncpa [#allocation6], 1 }
 0x365   :  { %2430 = vsyncpa [#allocation6 + $0x1], 1 }
 0x366   :  { %2431 = vsyncpa [#allocation9], 1 }
 0x367   :  { %2433 = vsyncpa [#allocation9 + $0x1], 1 }
 0x368   :  { %2434 = vsyncpa [#allocation4], 1 }
 0x369   :  { %2436 = vsyncpa [#allocation4 + $0x1], 1 }

</bundles_post_ra>
